<compile_context>
chip_gen: v6e
topology: v6e:2x2x1
jax: 0.10.0
libtpu: 0.0.40
codegen_flags: <defaults>
</compile_context>

<pallas_src>
import functools

import jax
import jax.numpy as jnp
import numpy as np
from jax import lax
from jax.experimental import pallas as pl
from jax.experimental.pallas import tpu as pltpu


# Contract dim 0 of both operands: A^T . B (MXU-native transposed-LHS matmul).
_NT_DIMS = (((0,), (0,)), ((), ()))


def _dce_kernel(qc_ref, qi_ref, w_ref, bias_ref, o_ref, *, n, hw, eps):
    """One (batch, query-i) grid step.

    qc_ref   : [1, c, n*hw]   all queries of this batch, channel-major,
                              flattened over (query, position); resident across i.
    qi_ref   : [1, 1, c, hw]  query i only (thin per-step block, natural layout).
    w_ref    : [2*oc, c]      conv weight stacked as [W1; W2] along output rows.
    bias_ref : [oc, 1]        conv bias.
    o_ref    : [1, 1, oc, hw] output block for (batch, query i).
    """
    i = pl.program_id(1)

    # Element-wise / normalisation math in f32 (v5e has no bf16 VPU/EUP).
    qc = qc_ref[0].astype(jnp.float32)           # [c, n*hw]
    qi = qi_ref[0, 0].astype(jnp.float32)        # [c, hw]

    # ---- inverse L2 norms over channels (hoisted: once per grid step) -------
    inv_all = lax.rsqrt(jnp.sum(qc * qc, axis=0, keepdims=True) + 1e-12)  # [1, n*hw]
    inv_i = lax.rsqrt(jnp.sum(qi * qi, axis=0, keepdims=True) + 1e-12)    # [1, hw]
    # Pre-normalising the matmul operands turns the hw^2 divides of
    #   num / (|qk| * |qi| + eps)
    # into O(c * n*hw) multiplies; the cosine eps becomes the rsqrt guard above.
    qn_all = qc * inv_all                        # [c, n*hw] unit columns
    qn_i = qi * inv_i                            # [c, hw]

    # ---- fused similarity: ONE A^T.B matmul covering all n queries ----------
    mm_dtype = qc_ref.dtype                      # bf16 when compute_dtype=bf16
    sim = lax.dot_general(
        qn_all.astype(mm_dtype), qn_i.astype(mm_dtype),
        _NT_DIMS, preferred_element_type=jnp.float32)          # [n*hw, hw] cosines

    # ---- per-k max over "other" positions + min-max normalisation -----------
    # The heavy matmul is already fused across k; this is a tiny static unroll
    # of cheap 2-D reductions (n is small by construction of the module).
    acc = jnp.zeros((1, hw), jnp.float32)
    for k in range(n):
        sim_k = sim[k * hw:(k + 1) * hw, :]                    # [hw, hw] static slice
        sim_max = jnp.max(sim_k, axis=0, keepdims=True)        # [1, hw]
        smin = jnp.min(sim_max, axis=1, keepdims=True)         # [1, 1]
        smax = jnp.max(sim_max, axis=1, keepdims=True)         # [1, 1]
        normed = (sim_max - smin) / (smax - smin + eps)        # [1, hw]
        keep = (jnp.int32(k) != i).astype(jnp.float32)         # exclude k == i
        acc = acc + normed * keep
    sim_mean = acc * (1.0 / (n - 1))                           # [1, hw]

    # ---- fused 1x1 conv: W @ [qi ; sim_mean*qi] == W1@qi + (W2@qi)*sim_mean --
    proj = jnp.dot(w_ref[...], qi.astype(w_ref.dtype),
                   preferred_element_type=jnp.float32)          # [2*oc, hw]
    oc = proj.shape[0] // 2
    out = proj[:oc] + proj[oc:] * sim_mean + bias_ref[...]      # [oc, hw]
    o_ref[0, 0] = out.astype(o_ref.dtype)


def dce_forward(querys, weight, bias, *, compute_dtype=jnp.float32):
    """querys: [b, n, c, h, w]; weight: [oc, 2c] (1x1 conv kernel squeezed);
    bias: [oc].  Returns [b*n, oc, h, w] (NCHW), like the PyTorch module.

    compute_dtype controls the stored / MXU-operand dtype for q and the weights
    (bf16 halves HBM/VMEM traffic and doubles MXU rate; f32 is the validated
    default).  Element-wise math and accumulation are always f32.
    """
    b, n, c, h, w = querys.shape
    if n < 2:
        raise ValueError("DCE requires n >= 2 query maps (mean over n-1 pairs).")
    hw = h * w
    oc = weight.shape[0]
    assert weight.shape[1] == 2 * c

    q = querys.reshape(b, n, c, hw)
    # Channel-major, (query, position)-flattened layout: lane dim = n*hw (dense),
    # sublane dim = c.  Single transposed copy; the old duplicated [b,n,hw,c]
    # input is gone.
    qc = jnp.transpose(q, (0, 2, 1, 3)).reshape(b, c, n * hw).astype(compute_dtype)
    # Natural layout; only a thin [c, hw] slice per (batch, i) grid step is DMA'd.
    q_nat = q.astype(compute_dtype)

    # Stack W1 (original channels) over W2 (similarity-weighted channels).
    w_stacked = jnp.concatenate([weight[:, :c], weight[:, c:]],
                                axis=0).astype(compute_dtype)       # [2*oc, c]
    bias2 = bias.reshape(oc, 1).astype(jnp.float32)

    kernel = functools.partial(_dce_kernel, n=n, hw=hw, eps=1e-7)

    out = pl.pallas_call(
        kernel,
        out_shape=jax.ShapeDtypeStruct((b, n, oc, hw), jnp.float32),
        grid=(b, n),
        in_specs=[
            # Resident per batch (same block index for every i -> no re-DMA).
            pl.BlockSpec((1, c, n * hw), lambda bi, i: (bi, 0, 0)),
            # Thin per-step block: query i only.
            pl.BlockSpec((1, 1, c, hw), lambda bi, i: (bi, i, 0, 0)),
            pl.BlockSpec((2 * oc, c), lambda bi, i: (0, 0)),
            pl.BlockSpec((oc, 1), lambda bi, i: (0, 0)),
        ],
        out_specs=pl.BlockSpec((1, 1, oc, hw), lambda bi, i: (bi, i, 0, 0)),
        compiler_params=pltpu.CompilerParams(
            dimension_semantics=("parallel", "parallel"),
            vmem_limit_bytes=64 * 1024 * 1024,
        ),
    )(qc, q_nat, w_stacked, bias2)

    return out.reshape(b * n, oc, h, w)


def dce_reference(querys, weight, bias):
    """Pure-JAX reference mirroring the PyTorch forward (the module's inner loop
    is intended to exclude k == i; the reference and kernel implement that intent)."""
    b, n, c, h, w = querys.shape
    hw = h * w
    eps = 1e-7
    hi = jax.lax.Precision.HIGHEST
    q = querys.reshape(b, n, c, hw).astype(jnp.float32)
    sims = []
    for i in range(n):
        qi = q[:, i]                                          # [b, c, hw]
        qi_norm = jnp.sqrt(jnp.sum(qi * qi, axis=1))          # [b, hw]
        acc = []
        for k in range(n):
            if k == i:
                continue
            qk = q[:, k]
            qk_norm = jnp.sqrt(jnp.sum(qk * qk, axis=1))      # [b, hw]
            num = jnp.einsum('bcp,bcq->bpq', qk, qi, precision=hi)
            den = jnp.einsum('bp,bq->bpq', qk_norm, qi_norm) + eps
            sim = num / den
            sim_max = sim.max(axis=1)                         # [b, hw]
            smin = sim_max.min(axis=1, keepdims=True)
            smax = sim_max.max(axis=1, keepdims=True)
            acc.append((sim_max - smin) / (smax - smin + eps))
        sim_mean = jnp.stack(acc, axis=1).mean(axis=1)        # [b, hw]
        sims.append(sim_mean[:, None, :] * qi)                # [b, c, hw]
    q2 = jnp.stack(sims, axis=1)                              # [b, n, c, hw]
    cat = jnp.concatenate([q, q2], axis=2)                    # [b, n, 2c, hw]
    out = jnp.einsum('oc,bncp->bnop', weight, cat, precision=hi) \
        + bias[None, None, :, None]
    return out.reshape(b * n, weight.shape[0], h, w)


if __name__ == "__main__":
    # Small shapes consistent with the module: b=2 batches, n=3 query maps,
    # c=4 channels, 16x16 spatial (hw = 256 -> lane-dense, unmasked stores),
    # 1x1 conv mapping 2c -> oc=4.
    b, n, c, h, w = 2, 3, 4, 16, 16
    oc = 4

    key = jax.random.PRNGKey(0)
    kq, kw, kb = jax.random.split(key, 3)
    querys = jax.random.normal(kq, (b, n, c, h, w), dtype=jnp.float32)
    weight = 0.1 * jax.random.normal(kw, (oc, 2 * c), dtype=jnp.float32)
    bias = 0.1 * jax.random.normal(kb, (oc,), dtype=jnp.float32)

    ref = dce_reference(querys, weight, bias)

    # Default f32 path: validated against the exact reference.
    out = jax.block_until_ready(dce_forward(querys, weight, bias))
    assert out.shape == (b * n, oc, h, w)
    np.testing.assert_allclose(np.asarray(out), np.asarray(ref),
                               rtol=2e-2, atol=2e-2)

    # bf16 MXU-operand path (perf-review item): loose sanity bound only, since
    # the min-max normalisation amplifies bf16 rounding at this tiny c.
    out_bf16 = jax.block_until_ready(
        dce_forward(querys, weight, bias, compute_dtype=jnp.bfloat16))
    err = float(jnp.max(jnp.abs(out_bf16 - ref)))
    assert err < 0.25, f"bf16 path sanity check failed: max |diff| = {err}"

    print("KERNEL_OK")
</pallas_src>

<mosaic_0001>
module attributes {stable_mosaic.version = 11 : i64} {
  func.func @_dce_kernel(%arg0: i32, %arg1: i32, %arg2: memref<1x4x768xf32, #tpu.memory_space<vmem>>, %arg3: memref<1x1x4x256xf32, #tpu.memory_space<vmem>>, %arg4: memref<8x4xf32, #tpu.memory_space<vmem>>, %arg5: memref<4x1xf32, #tpu.memory_space<vmem>>, %arg6: memref<1x1x4x256xf32, #tpu.memory_space<vmem>>) attributes {dimension_semantics = [#tpu.dimension_semantics<parallel>, #tpu.dimension_semantics<parallel>], iteration_bounds = array<i64: 2, 3>, scalar_prefetch = 0 : i64, scratch_operands = 0 : i64, tpu.core_type = #tpu.core_type<tc>, window_params = [{transform_indices = @transform_0, window_bounds = array<i64: 1, 4, 768>}, {transform_indices = @transform_1, window_bounds = array<i64: 1, 1, 4, 256>}, {pipeline_mode = #tpu.pipeline_mode<synchronous>, transform_indices = @transform_2, window_bounds = array<i64: 8, 4>}, {pipeline_mode = #tpu.pipeline_mode<synchronous>, transform_indices = @transform_3, window_bounds = array<i64: 4, 1>}, {transform_indices = @transform_4, window_bounds = array<i64: 1, 1, 4, 256>}]} {
    %c0 = arith.constant 0 : index
    %c0_0 = arith.constant 0 : index
    %c0_1 = arith.constant 0 : index
    %0 = vector.load %arg2[%c0, %c0_0, %c0_1] : memref<1x4x768xf32, #tpu.memory_space<vmem>>, vector<1x4x768xf32>
    %1 = vector.shape_cast %0 : vector<1x4x768xf32> to vector<4x768xf32>
    %c0_2 = arith.constant 0 : index
    %c0_3 = arith.constant 0 : index
    %c0_4 = arith.constant 0 : index
    %c0_5 = arith.constant 0 : index
    %2 = vector.load %arg3[%c0_2, %c0_3, %c0_4, %c0_5] : memref<1x1x4x256xf32, #tpu.memory_space<vmem>>, vector<1x1x4x256xf32>
    %3 = vector.shape_cast %2 : vector<1x1x4x256xf32> to vector<4x256xf32>
    %4 = arith.mulf %1, %1 : vector<4x768xf32>
    %cst = arith.constant dense<0.000000e+00> : vector<768xf32>
    %5 = vector.multi_reduction <add>, %4, %cst [0] : vector<4x768xf32> to vector<768xf32>
    %6 = vector.shape_cast %5 : vector<768xf32> to vector<1x768xf32>
    %cst_6 = arith.constant 9.99999996E-13 : f32
    %7 = vector.broadcast %cst_6 : f32 to vector<1x768xf32>
    %8 = arith.addf %6, %7 : vector<1x768xf32>
    %9 = math.rsqrt %8 : vector<1x768xf32>
    %10 = arith.mulf %3, %3 : vector<4x256xf32>
    %cst_7 = arith.constant dense<0.000000e+00> : vector<256xf32>
    %11 = vector.multi_reduction <add>, %10, %cst_7 [0] : vector<4x256xf32> to vector<256xf32>
    %12 = vector.shape_cast %11 : vector<256xf32> to vector<1x256xf32>
    %cst_8 = arith.constant 9.99999996E-13 : f32
    %13 = vector.broadcast %cst_8 : f32 to vector<1x256xf32>
    %14 = arith.addf %12, %13 : vector<1x256xf32>
    %15 = math.rsqrt %14 : vector<1x256xf32>
    %16 = vector.broadcast %9 : vector<1x768xf32> to vector<4x768xf32>
    %17 = arith.mulf %1, %16 : vector<4x768xf32>
    %18 = vector.broadcast %15 : vector<1x256xf32> to vector<4x256xf32>
    %19 = arith.mulf %3, %18 : vector<4x256xf32>
    %cst_9 = arith.constant dense<0.000000e+00> : vector<768x256xf32>
    %20 = tpu.matmul %17, %19, %cst_9 {dimension_numbers = #tpu.dot_dimension_numbers<[0], [0], [1], [1], [0, 1, 1, 1], [], []>} : vector<4x768xf32>, vector<4x256xf32>, vector<768x256xf32> -> vector<768x256xf32>
    %cst_10 = arith.constant 0.000000e+00 : f32
    %21 = vector.broadcast %cst_10 : f32 to vector<1x256xf32>
    %22 = vector.extract_strided_slice %20 {offsets = [0, 0], sizes = [256, 256], strides = [1, 1]} : vector<768x256xf32> to vector<256x256xf32>
    %cst_11 = arith.constant dense<0xFF800000> : vector<256xf32>
    %23 = vector.multi_reduction <maximumf>, %22, %cst_11 [0] : vector<256x256xf32> to vector<256xf32>
    %24 = vector.shape_cast %23 : vector<256xf32> to vector<1x256xf32>
    %cst_12 = arith.constant dense<0x7F800000> : vector<1xf32>
    %25 = vector.multi_reduction <minimumf>, %24, %cst_12 [1] : vector<1x256xf32> to vector<1xf32>
    %26 = vector.shape_cast %25 : vector<1xf32> to vector<1x1xf32>
    %cst_13 = arith.constant dense<0xFF800000> : vector<1xf32>
    %27 = vector.multi_reduction <maximumf>, %24, %cst_13 [1] : vector<1x256xf32> to vector<1xf32>
    %28 = vector.shape_cast %27 : vector<1xf32> to vector<1x1xf32>
    %29 = vector.broadcast %26 : vector<1x1xf32> to vector<1x256xf32>
    %30 = arith.subf %24, %29 : vector<1x256xf32>
    %31 = arith.subf %28, %26 : vector<1x1xf32>
    %cst_14 = arith.constant 1.000000e-07 : f32
    %32 = vector.broadcast %cst_14 : f32 to vector<1x1xf32>
    %33 = arith.addf %31, %32 : vector<1x1xf32>
    %34 = vector.broadcast %33 : vector<1x1xf32> to vector<1x256xf32>
    %35 = arith.divf %30, %34 : vector<1x256xf32>
    %c0_i32 = arith.constant 0 : i32
    %36 = arith.cmpi ne, %c0_i32, %arg1 : i32
    %37 = arith.extui %36 : i1 to i32
    %38 = arith.sitofp %37 : i32 to f32
    %39 = vector.broadcast %38 : f32 to vector<1x256xf32>
    %40 = arith.mulf %35, %39 : vector<1x256xf32>
    %41 = arith.addf %21, %40 : vector<1x256xf32>
    %42 = vector.extract_strided_slice %20 {offsets = [256, 0], sizes = [256, 256], strides = [1, 1]} : vector<768x256xf32> to vector<256x256xf32>
    %cst_15 = arith.constant dense<0xFF800000> : vector<256xf32>
    %43 = vector.multi_reduction <maximumf>, %42, %cst_15 [0] : vector<256x256xf32> to vector<256xf32>
    %44 = vector.shape_cast %43 : vector<256xf32> to vector<1x256xf32>
    %cst_16 = arith.constant dense<0x7F800000> : vector<1xf32>
    %45 = vector.multi_reduction <minimumf>, %44, %cst_16 [1] : vector<1x256xf32> to vector<1xf32>
    %46 = vector.shape_cast %45 : vector<1xf32> to vector<1x1xf32>
    %cst_17 = arith.constant dense<0xFF800000> : vector<1xf32>
    %47 = vector.multi_reduction <maximumf>, %44, %cst_17 [1] : vector<1x256xf32> to vector<1xf32>
    %48 = vector.shape_cast %47 : vector<1xf32> to vector<1x1xf32>
    %49 = vector.broadcast %46 : vector<1x1xf32> to vector<1x256xf32>
    %50 = arith.subf %44, %49 : vector<1x256xf32>
    %51 = arith.subf %48, %46 : vector<1x1xf32>
    %cst_18 = arith.constant 1.000000e-07 : f32
    %52 = vector.broadcast %cst_18 : f32 to vector<1x1xf32>
    %53 = arith.addf %51, %52 : vector<1x1xf32>
    %54 = vector.broadcast %53 : vector<1x1xf32> to vector<1x256xf32>
    %55 = arith.divf %50, %54 : vector<1x256xf32>
    %c1_i32 = arith.constant 1 : i32
    %56 = arith.cmpi ne, %c1_i32, %arg1 : i32
    %57 = arith.extui %56 : i1 to i32
    %58 = arith.sitofp %57 : i32 to f32
    %59 = vector.broadcast %58 : f32 to vector<1x256xf32>
    %60 = arith.mulf %55, %59 : vector<1x256xf32>
    %61 = arith.addf %41, %60 : vector<1x256xf32>
    %62 = vector.extract_strided_slice %20 {offsets = [512, 0], sizes = [256, 256], strides = [1, 1]} : vector<768x256xf32> to vector<256x256xf32>
    %cst_19 = arith.constant dense<0xFF800000> : vector<256xf32>
    %63 = vector.multi_reduction <maximumf>, %62, %cst_19 [0] : vector<256x256xf32> to vector<256xf32>
    %64 = vector.shape_cast %63 : vector<256xf32> to vector<1x256xf32>
    %cst_20 = arith.constant dense<0x7F800000> : vector<1xf32>
    %65 = vector.multi_reduction <minimumf>, %64, %cst_20 [1] : vector<1x256xf32> to vector<1xf32>
    %66 = vector.shape_cast %65 : vector<1xf32> to vector<1x1xf32>
    %cst_21 = arith.constant dense<0xFF800000> : vector<1xf32>
    %67 = vector.multi_reduction <maximumf>, %64, %cst_21 [1] : vector<1x256xf32> to vector<1xf32>
    %68 = vector.shape_cast %67 : vector<1xf32> to vector<1x1xf32>
    %69 = vector.broadcast %66 : vector<1x1xf32> to vector<1x256xf32>
    %70 = arith.subf %64, %69 : vector<1x256xf32>
    %71 = arith.subf %68, %66 : vector<1x1xf32>
    %cst_22 = arith.constant 1.000000e-07 : f32
    %72 = vector.broadcast %cst_22 : f32 to vector<1x1xf32>
    %73 = arith.addf %71, %72 : vector<1x1xf32>
    %74 = vector.broadcast %73 : vector<1x1xf32> to vector<1x256xf32>
    %75 = arith.divf %70, %74 : vector<1x256xf32>
    %c2_i32 = arith.constant 2 : i32
    %76 = arith.cmpi ne, %c2_i32, %arg1 : i32
    %77 = arith.extui %76 : i1 to i32
    %78 = arith.sitofp %77 : i32 to f32
    %79 = vector.broadcast %78 : f32 to vector<1x256xf32>
    %80 = arith.mulf %75, %79 : vector<1x256xf32>
    %81 = arith.addf %61, %80 : vector<1x256xf32>
    %cst_23 = arith.constant 5.000000e-01 : f32
    %82 = vector.broadcast %cst_23 : f32 to vector<1x256xf32>
    %83 = arith.mulf %81, %82 : vector<1x256xf32>
    %c0_24 = arith.constant 0 : index
    %c0_25 = arith.constant 0 : index
    %84 = vector.load %arg4[%c0_24, %c0_25] : memref<8x4xf32, #tpu.memory_space<vmem>>, vector<8x4xf32>
    %cst_26 = arith.constant dense<0.000000e+00> : vector<8x256xf32>
    %85 = tpu.matmul %84, %3, %cst_26 {dimension_numbers = #tpu.dot_dimension_numbers<[1], [0], [0], [1], [0, 0, 1, 1], [], []>} : vector<8x4xf32>, vector<4x256xf32>, vector<8x256xf32> -> vector<8x256xf32>
    %86 = vector.extract_strided_slice %85 {offsets = [0, 0], sizes = [4, 256], strides = [1, 1]} : vector<8x256xf32> to vector<4x256xf32>
    %87 = vector.extract_strided_slice %85 {offsets = [4, 0], sizes = [4, 256], strides = [1, 1]} : vector<8x256xf32> to vector<4x256xf32>
    %88 = vector.broadcast %83 : vector<1x256xf32> to vector<4x256xf32>
    %89 = arith.mulf %87, %88 : vector<4x256xf32>
    %90 = arith.addf %86, %89 : vector<4x256xf32>
    %c0_27 = arith.constant 0 : index
    %c0_28 = arith.constant 0 : index
    %91 = vector.load %arg5[%c0_27, %c0_28] : memref<4x1xf32, #tpu.memory_space<vmem>>, vector<4x1xf32>
    %92 = vector.broadcast %91 : vector<4x1xf32> to vector<4x256xf32>
    %93 = arith.addf %90, %92 : vector<4x256xf32>
    %c0_29 = arith.constant 0 : index
    %c0_30 = arith.constant 0 : index
    %c0_31 = arith.constant 0 : index
    %c0_32 = arith.constant 0 : index
    %94 = vector.load %arg6[%c0_29, %c0_30, %c0_31, %c0_32] : memref<1x1x4x256xf32, #tpu.memory_space<vmem>>, vector<1x1x4x256xf32>
    %95 = vector.shape_cast %94 : vector<1x1x4x256xf32> to vector<4x256xf32>
    %96 = vector.shape_cast %93 : vector<4x256xf32> to vector<1x1x4x256xf32>
    tpu.vector_store %arg6[%c0_29, %c0_30, %c0_31, %c0_32], %96 {strides = array<i32>} : memref<1x1x4x256xf32, #tpu.memory_space<vmem>>, vector<1x1x4x256xf32>,
    return
  }
  func.func @transform_0(%arg0: i32, %arg1: i32) -> (i32, i32, i32) {
    %c0_i32 = arith.constant 0 : i32
    %c0_i32_0 = arith.constant 0 : i32
    %c0_i32_1 = arith.constant 0 : i32
    return %arg0, %c0_i32, %c0_i32_0 : i32, i32, i32
  }
  func.func @transform_1(%arg0: i32, %arg1: i32) -> (i32, i32, i32, i32) {
    %c0_i32 = arith.constant 0 : i32
    %c0_i32_0 = arith.constant 0 : i32
    %c0_i32_1 = arith.constant 0 : i32
    return %arg0, %arg1, %c0_i32, %c0_i32_0 : i32, i32, i32, i32
  }
  func.func @transform_2(%arg0: i32, %arg1: i32) -> (i32, i32) {
    %c0_i32 = arith.constant 0 : i32
    %c0_i32_0 = arith.constant 0 : i32
    %c0_i32_1 = arith.constant 0 : i32
    return %c0_i32, %c0_i32_0 : i32, i32
  }
  func.func @transform_3(%arg0: i32, %arg1: i32) -> (i32, i32) {
    %c0_i32 = arith.constant 0 : i32
    %c0_i32_0 = arith.constant 0 : i32
    %c0_i32_1 = arith.constant 0 : i32
    return %c0_i32, %c0_i32_0 : i32, i32
  }
  func.func @transform_4(%arg0: i32, %arg1: i32) -> (i32, i32, i32, i32) {
    %c0_i32 = arith.constant 0 : i32
    %c0_i32_0 = arith.constant 0 : i32
    %c0_i32_1 = arith.constant 0 : i32
    return %arg0, %arg1, %c0_i32, %c0_i32_0 : i32, i32, i32, i32
  }
}

</mosaic_0001>

<bundles_post_ra>
// kernel: tpu_custom_call.1
= control target key start
LH: loop header
LB: loop body
LE: loop exit
PB: predicated region body
PF: predicated region fallthrough
CT: control target
= control target key end

     0   :  { %s3271_s0 = inlined_call_operand.hbm [shape: f32[2,4,768], index: 0, kind: input, shape index: {}]   ;;  %s3272_s1 = inlined_call_operand.hbm [shape: f32[2,3,4,256], index: 1, kind: input, shape index: {}]   ;;  %s3273_s2 = inlined_call_operand.vmem [shape: f32[8,4], index: 2, kind: input, shape index: {}]   ;;  %s3274_s3 = inlined_call_operand.vmem [shape: f32[4,1], index: 3, kind: input, shape index: {}]   ;;  %s3275_s4 = inlined_call_operand.hbm [shape: f32[2,3,4,256], index: 4, kind: output, shape index: {}]  }
   0x1   :  { %3284 = sst [smem:[#allocation17_spill]] %s3271_s0 }
   0x2   :  { %3285 = sst [smem:[#allocation18_spill]] %s3275_s4 }
   0x3   :  { %9 = vsyncpa [#allocation3], 0 }
   0x4   :  { %11 = vsyncpa [#allocation3 + $0x1], 0 }
   0x5   :  { %12 = vsyncpa [#allocation6], 0 }
   0x6   :  { %14 = vsyncpa [#allocation6 + $0x1], 0 }
   0x7   :  { %15 = vsyncpa [#allocation4], 0 }
   0x8   :  { %17 = vsyncpa [#allocation4 + $0x1], 0  ;;  %s2507_s15 = smov 0   ;;  %s2509_s16 = smov 0  }
   0x9   :  { %s2511_s17 = smov 0   ;;  %s2513_s18 = smov 0  }
   0xa   :  { %s2515_s19 = smov 0   ;;  %s2517_s20 = smov 0  }
   0xb   :  { %s2519_s21 = smov 0   ;;  %s2521_s22 = smov 0  }
   0xc   :  { %s2523_s23 = smov 0   ;;  %s2525_s24 = smov 0  }
   0xd   :  { %s2527_s25 = smov 0  }
   0xe LB: > { %3286 = sst [smem:[#allocation11_spill]] %s2435_s15  ;;  %s3276_s26 = sadd.s32 4294967295, %s2475_s25   ;;  %s2475_s25 = sphi %s2527_s25, %s23_s25   ;;  %s2471_s24 = sphi %s2525_s24, %s3312_s24   ;;  %s2467_s23 = sphi %s2523_s23, %s3320_s23   ;;  %s2463_s22 = sphi %s2521_s22, %s3310_s22   ;;  %s2459_s21 = sphi %s2519_s21, %s3319_s21   ;;  %s2455_s20 = sphi %s2517_s20, %s3318_s20   ;;  %s2451_s19 = sphi %s2515_s19, %s3317_s19   ;;  %s2447_s18 = sphi %s2513_s18, %s3316_s18   ;;  %s2443_s17 = sphi %s2511_s17, %s3315_s17   ;;  %s2439_s16 = sphi %s2509_s16, %s3314_s16   ;;  %s2435_s15 = sphi %s2507_s15, %s3313_s15  }
   0xf   : > { %3287 = sst [smem:[#allocation12_spill]] %s2463_s22  ;;  %p49_p0 = scmp.ne.s32.totalorder %s2455_s20, %s2451_s19 }
  0x10   : > { %3288 = sst [smem:[#allocation13_spill]] %s2471_s24  ;;  %p50_p1 = scmp.eq.s32.totalorder %s2475_s25, 0 }
  0x11   : > { %p55_p2 = scmp.ne.s32.totalorder %s2451_s19, %s2447_s18  ;;  %p2569_p3 = scmp.eq.s32.totalorder %s3276_s26, 0 }
  0x12   : > { %p51_p4 = por %p50_p1, %p49_p0  ;;  %p2179_p5 = scmp.lt.s32.totalorder %s2475_s25, 6 }
  0x13   : > { %p2578_p6 = por %p2569_p3, %p55_p2  ;;  %s183_s5 = sand.u32 1, %s2455_s20  }
  0x14   : > { %s2157_s6 = smul.u32 24, %s183_s5  ;;  %p2586_p7 = pnand %p2179_p5, %p51_p4 }
  0x15   : > { %s2158_s7 = smul.u32 384, %s2471_s24  ;;  %p2046_p8 = scmp.ge.s32.totalorder %s2475_s25, 1 }
  0x16   : > { %s3292_s0 = sld [smem:[#allocation17_spill]]  ;;  %s187_s12 = scalar_lea.vmem [#allocation2], %s2157_s6 }
  0x17   : > { %s195_s13 = sshll.u32 %s187_s12, 4  ;;  %s184_s14 = scalar_lea.sflag [#allocation3], %s183_s5  ;;  %s196_s13 = int_to_ptr.vmem [resolvable:$true] %s195_s13 }
  0x18   : > { %p2297_p9 = pneg %p2586_p7  ;;  %s2308_s18 = scalar_lea.vmem %s196_s13, 384 }
  0x19   : > { %p2309_p10 = scmp.ne.s32.totalorder %s196_s13, %s2308_s18  ;;  %s2477_s28 = smov [#allocation2]  }
  0x1a   : > { %s2313_s26 = sshll.u32 %s2477_s28, 4  ;;  %s2314_s26 = int_to_ptr.vmem [resolvable:$false] %s2313_s26 }
  0x1b   : > { %p2311_p11 = pnand %p2309_p10, %p2297_p9  ;;  %s2315_s27 = scalar_lea.vmem %s2314_s26, 768 }
  0x1c   : > { %s193_s11 = scalar_lea.hbm %s3292_s0, %s2158_s7  ;;  %p2316_p13 = scmp.lt.s32.totalorder %s196_s13, %s2314_s26 }
  0x1d   : > { %p2312_p12 = pneg %p2311_p11  ;;  %p2317_p0 = scmp.lt.s32.totalorder %s2315_s27, %s2308_s18 }
  0x1f   : > { %p2318_p2 = por %p2317_p0, %p2316_p13 }
  0x21   : > { %p2319_p4 = pnand %p2318_p2, %p2312_p12 }
  0x23   : > { %2322 = shalt.err (!%p2319_p4)
}
  0x24   : > { %2171 = dma.hbm_to_vmem [thread:$0]  (!%p2586_p7), %s193_s11, 384, %s196_s13, %s184_s14  }
  0x25   : > { %p221_p9 = scmp.lt.s32.totalorder %s2475_s25, 7  ;;  %s2039_s27 = sadd.s32 4294967294, %s2475_s25  }
  0x26   : > { %s32_s28 = sadd.s32 1, %s2467_s23  ;;  %s70_s5 = sadd.s32 1, %s2443_s17 }
  0x27   : > { %p2601_p10 = pnand %p2046_p8, %p221_p9  ;;  %p33_p11 = scmp.ge.s32.totalorder %s32_s28, 3 }
  0x28   : > { %p77_p12 = scmp.ne.s32.totalorder %s2443_s17, %s2439_s16  ;;  %p83_p13 = scmp.ne.s32.totalorder %s2439_s16, %s2435_s15 }
  0x29   : > { %s3322_s28 = smov (%p33_p11, %s32_s28), 0  ;;  %s3295_s6 = sadd.s32 1, %s2471_s24 }
  0x2a   : > { %3294 = sst [smem:[#allocation14_spill]] %s3322_s28  ;;  %s3324_s6 = smov (!%p33_p11, %s3295_s6), %s2471_s24 }
  0x2b   : > { %s66_s7 = ssub.s32 %s2467_s23, %s3322_s28  ;;  %p2621_p7 = por %p77_p12, %p50_p1 }
  0x2c   : > { %p37_p8 = scmp.ge.s32.totalorder %s3324_s6, 2  ;;  %p2627_p0 = por %p83_p13, %p2569_p3 }
  0x2d   : > { %s3298_s10 = sadd.s32 4294967295, %s2475_s25   ;;  %p157_p4 = scmp.eq.s32.totalorder %s2039_s27, 5 }
  0x2e   : > { %p151_p2 = scmp.eq.s32.totalorder %s3298_s10, 5  ;;  %s3326_s6 = smov (%p37_p8, %s3324_s6), 0 }
  0x2f   : > { %3299 = sst [smem:[#allocation15_spill]] %s3326_s6  ;;  %p2639_p9 = por %p157_p4, %p83_p13 }
  0x30   : > { %p2635_p1 = por %p151_p2, %p77_p12  ;;  %s39_s29 = ssub.s32 %s2471_s24, %s3326_s6 }
  0x31   : > { %s202_s13 = sand.u32 1, %s2443_s17   ;;  %p40_p3 = scmp.eq.s32.totalorder %s39_s29, 0 }
  0x32   : > { %s3300_s11 = scalar_select %p2635_p1, 1, 0 }
  0x33   : > { %s67_s14 = sor.u32 %s66_s7, %s39_s29  ;;  %s3303_s18 = sadd.s32 1, %s2455_s20 }
  0x34   : > { %3301 = sst [smem:[#allocation16_spill]] %s3300_s11  ;;  %p68_p11 = scmp.eq.s32.totalorder %s67_s14, 0 }
  0x35   : > { %s2649_s27 = scalar_select %p40_p3, %s2455_s20, %s3303_s18  }
  0x36   : > { %s2652_s10 = scalar_select %p68_p11, %s2443_s17, %s70_s5  }
  0x37   : > { %s2043_s0 = sshll.u32 %s202_s13, 3  ;;  %s2044_s28 = sshll.u32 %s2467_s23, 1 }
  0x38   : > { %s2159_s15 = smul.u32 6, %s2471_s24  ;;  %s206_s4 = scalar_lea.vmem [#allocation5], %s2043_s0 }
  0x39   : > { %s216_s22 = sshll.u32 %s206_s4, 4  ;;  %p2660_p12 = pnand %p2179_p5, %p2621_p7  ;;  %s217_s22 = int_to_ptr.vmem [resolvable:$true] %s216_s22 }
  0x3a   : > { %s212_s6 = sadd.s32 %s2159_s15, %s2044_s28  ;;  %s203_s18 = scalar_lea.sflag [#allocation6], %s202_s13 }
  0x3b   : > { %s2045_s7 = sshll.u32 %s212_s6, 6  ;;  %p2325_p13 = pneg %p2660_p12 }
  0x3c   : > { %s214_s5 = scalar_lea.hbm %s3272_s1, %s2045_s7  ;;  %s2336_s24 = scalar_lea.vmem %s217_s22, 128 }
  0x3d   : > { %p2337_p8 = scmp.ne.s32.totalorder %s217_s22, %s2336_s24  ;;  %s2478_s0 = smov [#allocation5]  }
  0x3e   : > { %s2341_s4 = sshll.u32 %s2478_s0, 4  ;;  %s2342_s4 = int_to_ptr.vmem [resolvable:$false] %s2341_s4 }
  0x3f   : > { %p2339_p2 = pnand %p2337_p8, %p2325_p13  ;;  %s2343_s8 = scalar_lea.vmem %s2342_s4, 256 }
  0x40   : > { %p2344_p5 = scmp.lt.s32.totalorder %s217_s22, %s2342_s4  ;;  %p2345_p7 = scmp.lt.s32.totalorder %s2343_s8, %s2336_s24 }
  0x41   : > { %p2340_p4 = pneg %p2339_p2 }
  0x42   : > { %p2346_p3 = por %p2345_p7, %p2344_p5 }
  0x44   : > { %p2347_p11 = pnand %p2346_p3, %p2340_p4 }
  0x46   : > { %2350 = shalt.err (!%p2347_p11)
}
  0x47   : > { %2174 = dma.hbm_to_vmem [thread:$0]  (!%p2660_p12), %s214_s5, 128, %s217_s22, %s203_s18  }
  0x48   : > { %225 = sbr.rel (%p2601_p10) target bundleno = 897 (0x381), region = 36  ;;  %s227_s15 = sand.u32 (!%p2601_p10), 1, %s2451_s19  }
  0x49   : > { %s2160_s28 = smul.u32 (!%p2601_p10), 24, %s227_s15  ;;  %s228_s6 = scalar_lea.sflag (!%p2601_p10), [#allocation3], %s227_s15 }
  0x4b   : > { %s2674_s13 = scalar_lea.vmem (!%p2601_p10), [#allocation2], %s2160_s28 }
  0x4d   : > { %2422 = dma.done.wait (%p2578_p6), %s228_s6, 384  }
  0x4e   : > { %2424 = vsyncadd (%p2578_p6), %s228_s6, 4294966912  ;;  %s2681_s24 = sand.u32 1, %s2439_s16  }
  0x4f   : > { %s2047_s22 = sshll.u32 %s2681_s24, 3  ;;  %s237_s26 = scalar_lea.sflag [#allocation6], %s2681_s24 }
  0x50   : > { %s240_s11 = scalar_lea.vmem [#allocation5], %s2047_s22 }
  0x51   : > { %2426 = dma.done.wait (%p2627_p0), %s237_s26, 128  }
  0x52   : > { %2428 = vsyncadd (%p2627_p0), %s237_s26, 4294967168  ;;  %v2479_v0 = vmov 0.0   ;;  %v270_v1 = vld [vmem:[%s2674_s13] sm:$0xff]  ;;  %vm286_vm0 = vcmask 1043456   ;;  %v2703_v39 = vld [vmem:[%s2674_s13 + $0x8] sm:$0xff]  ;;  %vm586_vm1 = vcmask 31744  }
  0x53   : > { %943 = vmatprep.mubr.f32.mxu0 %v2479_v0  ;;  %1237 = vmatprep.mubr.f32.mxu1 %v2479_v0  ;;  %v2694_v2 = vld [vmem:[%s240_s11] sm:$0xff]  ;;  %v274_v3 = vmul.f32 %v270_v1, %v270_v1  ;;  %v275_v41 = vmul.f32 %v2703_v39, %v2703_v39  ;;  %p1702_p6 = scmp.ne.s32.totalorder %s2459_s21, 1  ;;  %p1607_p10 = scmp.ne.s32.totalorder %s2459_s21, 0 }
  0x54   : > { %v341_v4 = vmul.f32 %v2694_v2, %v2694_v2  ;;  %v272_v45 = vld [vmem:[%s2674_s13 + $0x10] sm:$0xff]  ;;  %p1797_p0 = scmp.ne.s32.totalorder %s2459_s21, 2  ;;  %s3305_s15 = sld [smem:[#allocation12_spill]] }
  0x55   : > { %v280_v5 = vcombine.high %v274_v3, %v274_v3  ;;  %v287_v6 = vsel %vm286_vm0, %v274_v3, 0.0  ;;  %v281_v48 = vcombine.high %v275_v41, %v275_v41  ;;  %v276_v51 = vmul.f32 %v272_v45, %v272_v45  ;;  %s1703_s14 = scalar_select %p1702_p6, 1, 0 }
  0x56   : > { %v288_v7 = vrot.slane %v287_v6, 4  ;;  %v343_v8 = vcombine.high %v341_v4, %v341_v4  ;;  %v345_v9 = vsel %vm286_vm0, %v341_v4, 0.0  ;;  %v301_v52 = vsel %vm286_vm0, %v275_v41, 0.0  ;;  %s1608_s5 = scalar_select %p1607_p10, 1, 0 }
  0x57   : > { %v294_v10 = vsel %vm286_vm0, %v280_v5, 0.0  ;;  %v346_v11 = vrot.slane %v345_v9, 4  ;;  %v308_v54 = vsel %vm286_vm0, %v281_v48, 0.0  ;;  %v302_v56 = vrot.slane %v301_v52, 4  ;;  %s1704_s18 = scvt.s32.f32 %s1703_s14  ;;  %s2151_s6 = sshll.u32 %s2459_s21, 1 }
  0x58   : > { %v289_v12 = vadd.f32 %v288_v7, %v287_v6  ;;  %v295_v13 = vrot.slane %v294_v10, 4  ;;  %v352_v15 = vsel %vm286_vm0, %v343_v8, 0.0  ;;  %v282_v57 = vcombine.high %v276_v51, %v276_v51  ;;  %s1798_s0 = scalar_select %p1797_p0, 1, 0 }
  0x59   : > { %v347_v14 = vadd.f32 %v346_v11, %v345_v9  ;;  %v353_v19 = vrot.slane %v352_v15, 4  ;;  %v309_v58 = vrot.slane %v308_v54, 4  ;;  %v315_v59 = vsel %vm286_vm0, %v276_v51, 0.0  ;;  %s1609_s4 = scvt.s32.f32 %s1608_s5  ;;  %s269_s30 = scalar_lea.vmem [#allocation7], %s2047_s22 }
  0x5a   : > { %v290_v16 = vrot.slane %v289_v12, 2  ;;  %v296_v17 = vadd.f32 %v295_v13, %v294_v10  ;;  %v303_v60 = vadd.f32 %v302_v56, %v301_v52  ;;  %v322_v61 = vsel %vm286_vm0, %v282_v57, 0.0  ;;  %s1799_s8 = scvt.s32.f32 %s1798_s0  ;;  %s2161_s28 = smul.u32 6, %s3305_s15 }
  0x5b   : > { %v348_v18 = vrot.slane %v347_v14, 2  ;;  %v354_v23 = vadd.f32 %v353_v19, %v352_v15  ;;  %v310_v62 = vadd.f32 %v309_v58, %v308_v54  ;;  %v316_v63 = vrot.slane %v315_v59, 4  ;;  %s1928_s9 = sshll.u32 %s269_s30, 4  ;;  %s3307_s21 = sld [smem:[#allocation18_spill]]  ;;  %s1929_s9 = int_to_ptr.vmem [resolvable:$true] %s1928_s9 }
  0x5c   : > { %v291_v20 = vadd.f32 %v290_v16, %v289_v12  ;;  %v297_v21 = vrot.slane %v296_v17, 2  ;;  %v304_v3 = vrot.slane %v303_v60, 2  ;;  %s1924_s13 = sadd.s32 %s2161_s28, %s2151_s6  ;;  %s2351_s0 = scalar_lea.vmem %s1929_s9, 128 }
  0x5d   : > { %v349_v22 = vadd.f32 %v348_v18, %v347_v14  ;;  %v355_v27 = vrot.slane %v354_v23, 2  ;;  %v311_v4 = vrot.slane %v310_v62, 2  ;;  %v317_v5 = vadd.f32 %v316_v63, %v315_v59  ;;  %s2152_s11 = sshll.u32 %s1924_s13, 6  ;;  %p2352_p12 = scmp.ne.s32.totalorder %s1929_s9, %s2351_s0 }
  0x5e   : > { %v292_v24 = vrot.slane %v291_v20, 1  ;;  %v298_v25 = vadd.f32 %v297_v21, %v296_v17  ;;  %v305_v7 = vadd.f32 %v304_v3, %v303_v60 }
  0x5f   : > { %v350_v26 = vrot.slane %v349_v22, 1  ;;  %v356_v31 = vadd.f32 %v355_v27, %v354_v23  ;;  %v312_v8 = vadd.f32 %v311_v4, %v310_v62  ;;  %v318_v9 = vrot.slane %v317_v5, 2  ;;  %p2353_p13 = pnand %p2352_p12, %p2635_p1 }
  0x60   : > { %v293_v28 = vadd.f32 %v292_v24, %v291_v20  ;;  %v299_v29 = vrot.slane %v298_v25, 1  ;;  %v306_v11 = vrot.slane %v305_v7, 1 }
  0x61   : > { %v351_v30 = vadd.f32 %v350_v26, %v349_v22  ;;  %v357_v34 = vrot.slane %v356_v31, 1  ;;  %v313_v12 = vrot.slane %v312_v8, 1  ;;  %v319_v13 = vadd.f32 %v318_v9, %v317_v5  ;;  %s3308_s14 = smov %s3307_s21  ;;  %s1926_s5 = scalar_lea.hbm %s3307_s21, %s2152_s11 }
  0x62   : > { %v300_v32 = vadd.f32 %v299_v29, %v298_v25  ;;  %v329_v33 = vadd.f32 1e-12, %v293_v28  ;;  %v307_v15 = vadd.f32 %v306_v11, %v305_v7  ;;  %p2354_p8 = pneg %p2353_p13 }
  0x63   : > { %v359_v36 = vadd.f32 1e-12, %v351_v30  ;;  %v358_v37 = vadd.f32 %v357_v34, %v356_v31  ;;  %v314_v16 = vadd.f32 %v313_v12, %v312_v8  ;;  %v320_v17 = vrot.slane %v319_v13, 1 }
  0x64   : > { %v330_v35 = vadd.f32 1e-12, %v300_v32  ;;  %2273 = vrsqrt.f32 %v329_v33  ;;  %v331_v19 = vadd.f32 1e-12, %v307_v15 }
  0x65   : > { %v360_v38 = vadd.f32 1e-12, %v358_v37  ;;  %v332_v20 = vadd.f32 1e-12, %v314_v16  ;;  %v321_v21 = vadd.f32 %v320_v17, %v319_v13 }
  0x66   : > { %2275 = vrsqrt.f32 %v330_v35 }
  0x67   : > { %2277 = vrsqrt.f32 %v359_v36  ;;  %v333_v23 = vadd.f32 1e-12, %v321_v21 }
  0x68   : > { %2279 = vrsqrt.f32 %v360_v38 }
  0x69   : > { %2281 = vrsqrt.f32 %v331_v19 }
  0x6a   : > { %2283 = vrsqrt.f32 %v332_v20 }
  0x6b   : > { %2285 = vrsqrt.f32 %v333_v23 }
  0x71   : > { %v2274_v40 = vpop.eup %2273 }
  0x73   : > { %v2276_v42 = vpop.eup %2275 }
  0x74   : > { %v369_v43 = vcombine.low %v2274_v40, %v2276_v42  ;;  %v2278_v44 = vpop.eup %2277 }
  0x75   : > { %v2280_v46 = vpop.eup %2279 }
  0x76   : > { %v375_v47 = vmul.f32 %v369_v43, %v270_v1  ;;  %v380_v49 = vcombine.low %v2278_v44, %v2280_v46  ;;  %v323_v1 = vrot.slane %v322_v61, 4  ;;  %v2282_v25 = vpop.eup %2281 }
  0x77   : > { %v2284_v26 = vpop.eup %2283 }
  0x78   : > { %392 = vxpose.xlu0.b32.start.end [1/1] (short) %v375_v47, 128  ;;  %v386_v50 = vcombine.high %v375_v47, %v375_v47  ;;  %v382_v53 = vmul.f32 %v380_v49, %v2694_v2  ;;  %v324_v6 = vadd.f32 %v323_v1, %v322_v61  ;;  %v370_v27 = vcombine.low %v2282_v25, %v2284_v26  ;;  %v2286_v28 = vpop.eup %2285 }
  0x7a   : > { %424 = vxpose.xlu1.b32.start.end [1/1] (short) %v386_v50, 128  ;;  %v585_v55 = vcombine.high %v382_v53, %v382_v53  ;;  %v325_v10 = vrot.slane %v324_v6, 2  ;;  %v376_v30 = vmul.f32 %v370_v27, %v2703_v39 }
  0x7c   : > { %2049 = vmatprep.subr.msk.mxu0 %vm286_vm0, %v585_v55  ;;  %2155 = vmatprep.subr.msk.mxu1 %vm286_vm0, %v585_v55  ;;  %v326_v14 = vadd.f32 %v325_v10, %v324_v6  ;;  %v387_v32 = vcombine.high %v376_v30, %v376_v30 }
  0x7d   : > { %2050 = vmatpush1.msk.msra.mxu0 %vm286_vm0, %v382_v53  ;;  %2156 = vmatpush1.msk.msra.mxu1 %vm286_vm0, %v382_v53 }
  0x7e   : > { %v327_v18 = vrot.slane %v326_v14, 1 }
  0x80   : > { %v328_v22 = vadd.f32 %v327_v18, %v326_v14 }
  0x82   : > { %v334_v24 = vadd.f32 1e-12, %v328_v22 }
  0x84   : > { %2287 = vrsqrt.f32 %v334_v24 }
  0x91   : > { %v2288_v29 = vpop.eup %2287 }
  0x92   : > { %v371_v31 = vcombine.low %v2286_v28, %v2288_v29  ;;  %v1809_v29 = vcombine.high %v2694_v2, %v2694_v2 }
  0x94   : > { %v377_v33 = vmul.f32 %v371_v31, %v272_v45  ;;  %2147 = vmatprep.subr.msk.mxu1 %vm286_vm0, %v1809_v29 }
  0x96   : > { %v388_v34 = vcombine.high %v377_v33, %v377_v33 }
  0xb5   : > { %488 = vxpose.xlu0.b32.start.end [1/1] (short) %v387_v32, 128 }
  0xb7   : > { %520 = vxpose.xlu1.b32.start.end [1/1] (short) %v377_v33, 128 }
  0xf2   : > { %456 = vxpose.xlu0.b32.start.end [1/1] (short) %v376_v30, 128 }
  0xf4   : > { %v408_v35 = vpop.trf.xlu0  ;;  %552 = vxpose.xlu1.b32.start.end [1/1] (short) %v388_v34, 128 }
  0xf5   : > { %2051 = vmatmul.mubr.msk.f32.vlgmr.msra.gmra.mxu0 %vm586_vm1, %v408_v35 }
  0xf6   : > { %949 = vmatprep.mubr.f32.mxu0 %v2479_v0  ;;  %v440_v36 = vpop.trf.xlu1 }
  0xf8   : > { %v409_v37 = vpop.trf.xlu0 }
  0xf9   : > { %2052 = vmatmul.mubr.msk.f32.gmra.mxu0 %vm586_vm1, %v409_v37 }
  0xfa   : > { %955 = vmatprep.mubr.f32.mxu0 %v2479_v0  ;;  %v441_v38 = vpop.trf.xlu1 }
  0xfc   : > { %v410_v39 = vpop.trf.xlu0 }
  0xfd   : > { %2053 = vmatmul.mubr.msk.f32.gmra.mxu0 %vm586_vm1, %v410_v39 }
  0xfe   : > { %961 = vmatprep.mubr.f32.mxu0 %v2479_v0  ;;  %v2724_v40 = vpop.trf.xlu1 }
 0x100   : > { %v411_v41 = vpop.trf.xlu0 }
 0x101   : > { %2054 = vmatmul.mubr.msk.f32.gmra.mxu0 %vm586_vm1, %v411_v41 }
 0x102   : > { %967 = vmatprep.mubr.f32.mxu0 %v2479_v0  ;;  %v2728_v42 = vpop.trf.xlu1 }
 0x104   : > { %v412_v43 = vpop.trf.xlu0 }
 0x105   : > { %2055 = vmatmul.mubr.msk.f32.gmra.mxu0 %vm586_vm1, %v412_v43 }
 0x106   : > { %973 = vmatprep.mubr.f32.mxu0 %v2479_v0  ;;  %v2732_v44 = vpop.trf.xlu1 }
 0x108   : > { %v413_v45 = vpop.trf.xlu0 }
 0x109   : > { %2056 = vmatmul.mubr.msk.f32.gmra.mxu0 %vm586_vm1, %v413_v45 }
 0x10a   : > { %979 = vmatprep.mubr.f32.mxu0 %v2479_v0  ;;  %v2736_v46 = vpop.trf.xlu1 }
 0x10c   : > { %v414_v47 = vpop.trf.xlu0 }
 0x10d   : > { %2057 = vmatmul.mubr.msk.f32.gmra.mxu0 %vm586_vm1, %v414_v47 }
 0x10e   : > { %985 = vmatprep.mubr.f32.mxu0 %v2479_v0  ;;  %v2740_v48 = vpop.trf.xlu1 }
 0x110   : > { %v415_v49 = vpop.trf.xlu0 }
 0x111   : > { %2058 = vmatmul.mubr.msk.f32.gmra.mxu0 %vm586_vm1, %v415_v49 }
 0x112   : > { %991 = vmatprep.mubr.f32.mxu0 %v2479_v0  ;;  %v2744_v50 = vpop.trf.xlu1 }
 0x114   : > { %v416_v51 = vpop.trf.xlu0 }
 0x115   : > { %2059 = vmatmul.mubr.msk.f32.gmra.mxu0 %vm586_vm1, %v416_v51 }
 0x116   : > { %997 = vmatprep.mubr.f32.mxu0 %v2479_v0  ;;  %v2748_v52 = vpop.trf.xlu1 }
 0x118   : > { %v417_v53 = vpop.trf.xlu0 }
 0x119   : > { %2060 = vmatmul.mubr.msk.f32.gmra.mxu0 %vm586_vm1, %v417_v53 }
 0x11a   : > { %1003 = vmatprep.mubr.f32.mxu0 %v2479_v0  ;;  %v2752_v54 = vpop.trf.xlu1 }
 0x11c   : > { %v418_v55 = vpop.trf.xlu0 }
 0x11d   : > { %2061 = vmatmul.mubr.msk.f32.gmra.mxu0 %vm586_vm1, %v418_v55 }
 0x11e   : > { %1009 = vmatprep.mubr.f32.mxu0 %v2479_v0  ;;  %v2756_v56 = vpop.trf.xlu1 }
 0x120   : > { %v419_v57 = vpop.trf.xlu0 }
 0x121   : > { %2062 = vmatmul.mubr.msk.f32.gmra.mxu0 %vm586_vm1, %v419_v57 }
 0x122   : > { %1015 = vmatprep.mubr.f32.mxu0 %v2479_v0  ;;  %v2760_v58 = vpop.trf.xlu1 }
 0x124   : > { %v420_v59 = vpop.trf.xlu0 }
 0x125   : > { %2063 = vmatmul.mubr.msk.f32.gmra.mxu0 %vm586_vm1, %v420_v59 }
 0x126   : > { %1021 = vmatprep.mubr.f32.mxu0 %v2479_v0  ;;  %v2764_v60 = vpop.trf.xlu1 }
 0x128   : > { %v421_v61 = vpop.trf.xlu0 }
 0x129   : > { %2064 = vmatmul.mubr.msk.f32.gmra.mxu0 %vm586_vm1, %v421_v61 }
 0x12a   : > { %1027 = vmatprep.mubr.f32.mxu0 %v2479_v0  ;;  %v2768_v62 = vpop.trf.xlu1 }
 0x12c   : > { %v422_v63 = vpop.trf.xlu0 }
 0x12d   : > { %2065 = vmatmul.mubr.msk.f32.gmra.mxu0 %vm586_vm1, %v422_v63 }
 0x12e   : > { %1033 = vmatprep.mubr.f32.mxu0 %v2479_v0  ;;  %v2772_v1 = vpop.trf.xlu1 }
 0x130   : > { %v423_v3 = vpop.trf.xlu0 }
 0x131   : > { %2066 = vmatmul.mubr.msk.f32.gmra.mxu0 %vm586_vm1, %v423_v3 }
 0x132   : > { %1039 = vmatprep.mubr.f32.mxu0 %v2479_v0  ;;  %v2776_v4 = vpop.trf.xlu1 }
 0x134   : > { %v2778_v5 = vpop.trf.xlu0 }
 0x135   : > { %2067 = vmatmul.mubr.msk.f32.gmra.mxu0 %vm586_vm1, %v440_v36 }
 0x136   : > { %1045 = vmatprep.mubr.f32.mxu0 %v2479_v0  ;;  %v2782_v6 = vpop.trf.xlu1 }
 0x138   : > { %v505_v7 = vpop.trf.xlu0 }
 0x139   : > { %2068 = vmatmul.mubr.msk.f32.gmra.mxu0 %vm586_vm1, %v441_v38  ;;  %2100 = vmatmul.mubr.msk.f32.vlgmr.msra.gmra.mxu1 %vm586_vm1, %v505_v7 }
 0x13a   : > { %1243 = vmatprep.mubr.f32.mxu1 %v2479_v0  ;;  %1051 = vmatprep.mubr.f32.mxu0 %v2479_v0  ;;  %v2788_v8 = vpop.trf.xlu1 }
 0x13b   : > { %2148 = vmatpush1.msk.msra.mxu1 %vm286_vm0, %v2694_v2 }
 0x13c   : > { %v506_v9 = vpop.trf.xlu0 }
 0x13d   : > { %2069 = vmatmul.mubr.msk.f32.gmra.mxu0 %vm586_vm1, %v2724_v40  ;;  %2101 = vmatmul.mubr.msk.f32.gmra.mxu1 %vm586_vm1, %v506_v9 }
 0x13e   : > { %1249 = vmatprep.mubr.f32.mxu1 %v2479_v0  ;;  %1057 = vmatprep.mubr.f32.mxu0 %v2479_v0  ;;  %v2795_v11 = vpop.trf.xlu1 }
 0x140   : > { %v507_v10 = vpop.trf.xlu0 }
 0x141   : > { %2070 = vmatmul.mubr.msk.f32.gmra.mxu0 %vm586_vm1, %v2728_v42  ;;  %2102 = vmatmul.mubr.msk.f32.gmra.mxu1 %vm586_vm1, %v507_v10 }
 0x142   : > { %1255 = vmatprep.mubr.f32.mxu1 %v2479_v0  ;;  %1063 = vmatprep.mubr.f32.mxu0 %v2479_v0  ;;  %v2807_v13 = vpop.trf.xlu1 }
 0x144   : > { %v508_v12 = vpop.trf.xlu0 }
 0x145   : > { %2071 = vmatmul.mubr.msk.f32.gmra.mxu0 %vm586_vm1, %v2732_v44  ;;  %2103 = vmatmul.mubr.msk.f32.gmra.mxu1 %vm586_vm1, %v508_v12 }
 0x146   : > { %1261 = vmatprep.mubr.f32.mxu1 %v2479_v0  ;;  %1069 = vmatprep.mubr.f32.mxu0 %v2479_v0  ;;  %v2814_v16 = vpop.trf.xlu1 }
 0x148   : > { %v509_v14 = vpop.trf.xlu0 }
 0x149   : > { %2072 = vmatmul.mubr.msk.f32.gmra.mxu0 %vm586_vm1, %v2736_v46  ;;  %2104 = vmatmul.mubr.msk.f32.gmra.mxu1 %vm586_vm1, %v509_v14 }
 0x14a   : > { %1267 = vmatprep.mubr.f32.mxu1 %v2479_v0  ;;  %1075 = vmatprep.mubr.f32.mxu0 %v2479_v0  ;;  %v2826_v18 = vpop.trf.xlu1 }
 0x14c   : > { %v510_v15 = vpop.trf.xlu0 }
 0x14d   : > { %2073 = vmatmul.mubr.msk.f32.gmra.mxu0 %vm586_vm1, %v2740_v48  ;;  %2105 = vmatmul.mubr.msk.f32.gmra.mxu1 %vm586_vm1, %v510_v15 }
 0x14e   : > { %1273 = vmatprep.mubr.f32.mxu1 %v2479_v0  ;;  %1081 = vmatprep.mubr.f32.mxu0 %v2479_v0  ;;  %v2833_v21 = vpop.trf.xlu1 }
 0x150   : > { %v511_v17 = vpop.trf.xlu0 }
 0x151   : > { %2074 = vmatmul.mubr.msk.f32.gmra.mxu0 %vm586_vm1, %v2744_v50  ;;  %2106 = vmatmul.mubr.msk.f32.gmra.mxu1 %vm586_vm1, %v511_v17 }
 0x152   : > { %1279 = vmatprep.mubr.f32.mxu1 %v2479_v0  ;;  %1087 = vmatprep.mubr.f32.mxu0 %v2479_v0  ;;  %v2845_v23 = vpop.trf.xlu1 }
 0x154   : > { %v512_v19 = vpop.trf.xlu0 }
 0x155   : > { %2075 = vmatmul.mubr.msk.f32.gmra.mxu0 %vm586_vm1, %v2748_v52  ;;  %2107 = vmatmul.mubr.msk.f32.gmra.mxu1 %vm586_vm1, %v512_v19 }
 0x156   : > { %1285 = vmatprep.mubr.f32.mxu1 %v2479_v0  ;;  %1093 = vmatprep.mubr.f32.mxu0 %v2479_v0  ;;  %v2852_v26 = vpop.trf.xlu1 }
 0x158   : > { %v513_v20 = vpop.trf.xlu0 }
 0x159   : > { %2076 = vmatmul.mubr.msk.f32.gmra.mxu0 %vm586_vm1, %v2752_v54  ;;  %2108 = vmatmul.mubr.msk.f32.gmra.mxu1 %vm586_vm1, %v513_v20 }
 0x15a   : > { %1291 = vmatprep.mubr.f32.mxu1 %v2479_v0  ;;  %1099 = vmatprep.mubr.f32.mxu0 %v2479_v0  ;;  %v2864_v28 = vpop.trf.xlu1 }
 0x15c   : > { %v514_v22 = vpop.trf.xlu0 }
 0x15d   : > { %2077 = vmatmul.mubr.msk.f32.gmra.mxu0 %vm586_vm1, %v2756_v56  ;;  %2109 = vmatmul.mubr.msk.f32.gmra.mxu1 %vm586_vm1, %v514_v22 }
 0x15e   : > { %1297 = vmatprep.mubr.f32.mxu1 %v2479_v0  ;;  %1105 = vmatprep.mubr.f32.mxu0 %v2479_v0  ;;  %v2876_v32 = vpop.trf.xlu1 }
 0x160   : > { %v515_v24 = vpop.trf.xlu0 }
 0x161   : > { %2078 = vmatmul.mubr.msk.f32.gmra.mxu0 %vm586_vm1, %v2760_v58  ;;  %2110 = vmatmul.mubr.msk.f32.gmra.mxu1 %vm586_vm1, %v515_v24 }
 0x162   : > { %1303 = vmatprep.mubr.f32.mxu1 %v2479_v0  ;;  %1111 = vmatprep.mubr.f32.mxu0 %v2479_v0  ;;  %v547_v2 = vpop.trf.xlu1 }
 0x164   : > { %v516_v25 = vpop.trf.xlu0 }
 0x165   : > { %2079 = vmatmul.mubr.msk.f32.gmra.mxu0 %vm586_vm1, %v2764_v60  ;;  %2111 = vmatmul.mubr.msk.f32.gmra.mxu1 %vm586_vm1, %v516_v25 }
 0x166   : > { %1309 = vmatprep.mubr.f32.mxu1 %v2479_v0  ;;  %1117 = vmatprep.mubr.f32.mxu0 %v2479_v0  ;;  %v548_v36 = vpop.trf.xlu1 }
 0x168   : > { %v517_v27 = vpop.trf.xlu0 }
 0x169   : > { %2080 = vmatmul.mubr.msk.f32.gmra.mxu0 %vm586_vm1, %v2768_v62  ;;  %2112 = vmatmul.mubr.msk.f32.gmra.mxu1 %vm586_vm1, %v517_v27 }
 0x16a   : > { %1315 = vmatprep.mubr.f32.mxu1 %v2479_v0  ;;  %1123 = vmatprep.mubr.f32.mxu0 %v2479_v0  ;;  %v549_v38 = vpop.trf.xlu1 }
 0x16c   : > { %v518_v30 = vpop.trf.xlu0 }
 0x16d   : > { %2081 = vmatmul.mubr.msk.f32.gmra.mxu0 %vm586_vm1, %v2772_v1  ;;  %2113 = vmatmul.mubr.msk.f32.gmra.mxu1 %vm586_vm1, %v518_v30 }
 0x16e   : > { %1321 = vmatprep.mubr.f32.mxu1 %v2479_v0  ;;  %1129 = vmatprep.mubr.f32.mxu0 %v2479_v0  ;;  %v550_v41 = vpop.trf.xlu1 }
 0x170   : > { %v519_v31 = vpop.trf.xlu0 }
 0x171   : > { %2082 = vmatmul.mubr.msk.f32.gmra.mxu0 %vm586_vm1, %v2776_v4  ;;  %2114 = vmatmul.mubr.msk.f32.gmra.mxu1 %vm586_vm1, %v519_v31 }
 0x172   : > { %1327 = vmatprep.mubr.f32.mxu1 %v2479_v0  ;;  %1135 = vmatprep.mubr.f32.mxu0 %v2479_v0  ;;  %v551_v43 = vpop.trf.xlu1 }
 0x174   : > { %v472_v33 = vpop.trf.xlu0 }
 0x175   : > { %2083 = vmatmul.mubr.msk.f32.gmra.mxu0 %vm586_vm1, %v472_v33  ;;  %2115 = vmatmul.mubr.msk.f32.gmra.mxu1 %vm586_vm1, %v2782_v6 }
 0x176   : > { %1141 = vmatprep.mubr.f32.mxu0 %v2479_v0  ;;  %1333 = vmatprep.mubr.f32.mxu1 %v2479_v0  ;;  %v568_v46 = vpop.trf.xlu1 }
 0x178   : > { %v473_v34 = vpop.trf.xlu0 }
 0x179   : > { %2084 = vmatmul.mubr.msk.f32.gmra.mxu0 %vm586_vm1, %v473_v34  ;;  %2116 = vmatmul.mubr.msk.f32.gmra.mxu1 %vm586_vm1, %v2788_v8 }
 0x17a   : > { %1147 = vmatprep.mubr.f32.mxu0 %v2479_v0  ;;  %1339 = vmatprep.mubr.f32.mxu1 %v2479_v0  ;;  %v569_v48 = vpop.trf.xlu1 }
 0x17c   : > { %v474_v35 = vpop.trf.xlu0 }
 0x17d   : > { %2085 = vmatmul.mubr.msk.f32.gmra.mxu0 %vm586_vm1, %v474_v35  ;;  %2117 = vmatmul.mubr.msk.f32.gmra.mxu1 %vm586_vm1, %v2795_v11 }
 0x17e   : > { %1153 = vmatprep.mubr.f32.mxu0 %v2479_v0  ;;  %1345 = vmatprep.mubr.f32.mxu1 %v2479_v0  ;;  %v570_v51 = vpop.trf.xlu1 }
 0x180   : > { %v475_v37 = vpop.trf.xlu0 }
 0x181   : > { %2086 = vmatmul.mubr.msk.f32.gmra.mxu0 %vm586_vm1, %v475_v37  ;;  %2118 = vmatmul.mubr.msk.f32.gmra.mxu1 %vm586_vm1, %v2807_v13 }
 0x182   : > { %1159 = vmatprep.mubr.f32.mxu0 %v2479_v0  ;;  %1351 = vmatprep.mubr.f32.mxu1 %v2479_v0  ;;  %v571_v53 = vpop.trf.xlu1 }
 0x184   : > { %v476_v39 = vpop.trf.xlu0 }
 0x185   : > { %2087 = vmatmul.mubr.msk.f32.gmra.mxu0 %vm586_vm1, %v476_v39  ;;  %2119 = vmatmul.mubr.msk.f32.gmra.mxu1 %vm586_vm1, %v2814_v16 }
 0x186   : > { %1165 = vmatprep.mubr.f32.mxu0 %v2479_v0  ;;  %1357 = vmatprep.mubr.f32.mxu1 %v2479_v0  ;;  %v572_v56 = vpop.trf.xlu1 }
 0x188   : > { %v477_v40 = vpop.trf.xlu0 }
 0x189   : > { %2088 = vmatmul.mubr.msk.f32.gmra.mxu0 %vm586_vm1, %v477_v40  ;;  %2120 = vmatmul.mubr.msk.f32.gmra.mxu1 %vm586_vm1, %v2826_v18 }
 0x18a   : > { %1171 = vmatprep.mubr.f32.mxu0 %v2479_v0  ;;  %1363 = vmatprep.mubr.f32.mxu1 %v2479_v0  ;;  %v573_v58 = vpop.trf.xlu1 }
 0x18c   : > { %v478_v42 = vpop.trf.xlu0 }
 0x18d   : > { %2089 = vmatmul.mubr.msk.f32.gmra.mxu0 %vm586_vm1, %v478_v42  ;;  %2121 = vmatmul.mubr.msk.f32.gmra.mxu1 %vm586_vm1, %v2833_v21 }
 0x18e   : > { %1177 = vmatprep.mubr.f32.mxu0 %v2479_v0  ;;  %1369 = vmatprep.mubr.f32.mxu1 %v2479_v0  ;;  %v574_v61 = vpop.trf.xlu1 }
 0x190   : > { %v479_v44 = vpop.trf.xlu0 }
 0x191   : > { %2090 = vmatmul.mubr.msk.f32.gmra.mxu0 %vm586_vm1, %v479_v44  ;;  %2122 = vmatmul.mubr.msk.f32.gmra.mxu1 %vm586_vm1, %v2845_v23 }
 0x192   : > { %1183 = vmatprep.mubr.f32.mxu0 %v2479_v0  ;;  %1375 = vmatprep.mubr.f32.mxu1 %v2479_v0  ;;  %v575_v4 = vpop.trf.xlu1 }
 0x194   : > { %v480_v45 = vpop.trf.xlu0 }
 0x195   : > { %2091 = vmatmul.mubr.msk.f32.gmra.mxu0 %vm586_vm1, %v480_v45  ;;  %2123 = vmatmul.mubr.msk.f32.gmra.mxu1 %vm586_vm1, %v2852_v26 }
 0x196   : > { %1189 = vmatprep.mubr.f32.mxu0 %v2479_v0  ;;  %1381 = vmatprep.mubr.f32.mxu1 %v2479_v0  ;;  %v576_v11 = vpop.trf.xlu1 }
 0x198   : > { %v481_v47 = vpop.trf.xlu0 }
 0x199   : > { %2092 = vmatmul.mubr.msk.f32.gmra.mxu0 %vm586_vm1, %v481_v47  ;;  %2124 = vmatmul.mubr.msk.f32.gmra.mxu1 %vm586_vm1, %v2864_v28 }
 0x19a   : > { %1195 = vmatprep.mubr.f32.mxu0 %v2479_v0  ;;  %1387 = vmatprep.mubr.f32.mxu1 %v2479_v0  ;;  %v577_v18 = vpop.trf.xlu1 }
 0x19c   : > { %v482_v49 = vpop.trf.xlu0 }
 0x19d   : > { %2093 = vmatmul.mubr.msk.f32.gmra.mxu0 %vm586_vm1, %v482_v49  ;;  %2125 = vmatmul.mubr.msk.f32.gmra.mxu1 %vm586_vm1, %v2876_v32 }
 0x19e   : > { %1201 = vmatprep.mubr.f32.mxu0 %v2479_v0  ;;  %1393 = vmatprep.mubr.f32.mxu1 %v2479_v0  ;;  %v578_v25 = vpop.trf.xlu1 }
 0x1a0   : > { %v483_v50 = vpop.trf.xlu0 }
 0x1a1   : > { %2094 = vmatmul.mubr.msk.f32.gmra.mxu0 %vm586_vm1, %v483_v50  ;;  %2126 = vmatmul.mubr.msk.f32.gmra.mxu1 %vm586_vm1, %v547_v2 }
 0x1a2   : > { %1207 = vmatprep.mubr.f32.mxu0 %v2479_v0  ;;  %1399 = vmatprep.mubr.f32.mxu1 %v2479_v0  ;;  %v579_v32 = vpop.trf.xlu1 }
 0x1a4   : > { %v484_v52 = vpop.trf.xlu0 }
 0x1a5   : > { %2095 = vmatmul.mubr.msk.f32.gmra.mxu0 %vm586_vm1, %v484_v52  ;;  %2127 = vmatmul.mubr.msk.f32.gmra.mxu1 %vm586_vm1, %v548_v36 }
 0x1a6   : > { %1213 = vmatprep.mubr.f32.mxu0 %v2479_v0  ;;  %1405 = vmatprep.mubr.f32.mxu1 %v2479_v0 }
 0x1a8   : > { %v485_v54 = vpop.trf.xlu0 }
 0x1a9   : > { %2096 = vmatmul.mubr.msk.f32.gmra.mxu0 %vm586_vm1, %v485_v54  ;;  %2128 = vmatmul.mubr.msk.f32.gmra.mxu1 %vm586_vm1, %v549_v38  ;;  %v580_v38 = vpop.trf.xlu1 }
 0x1aa   : > { %1219 = vmatprep.mubr.f32.mxu0 %v2479_v0  ;;  %1411 = vmatprep.mubr.f32.mxu1 %v2479_v0 }
 0x1ac   : > { %v486_v55 = vpop.trf.xlu0 }
 0x1ad   : > { %2097 = vmatmul.mubr.msk.f32.gmra.mxu0 %vm586_vm1, %v486_v55  ;;  %2129 = vmatmul.mubr.msk.f32.gmra.mxu1 %vm586_vm1, %v550_v41  ;;  %v581_v44 = vpop.trf.xlu1 }
 0x1ae   : > { %1225 = vmatprep.mubr.f32.mxu0 %v2479_v0  ;;  %1417 = vmatprep.mubr.f32.mxu1 %v2479_v0 }
 0x1b0   : > { %v487_v57 = vpop.trf.xlu0 }
 0x1b1   : > { %2098 = vmatmul.mubr.msk.f32.gmra.mxu0 %vm586_vm1, %v487_v57  ;;  %2130 = vmatmul.mubr.msk.f32.gmra.mxu1 %vm586_vm1, %v551_v43 }
 0x1b2   : > { %1231 = vmatprep.mubr.f32.mxu0 %v2479_v0  ;;  %1423 = vmatprep.mubr.f32.mxu1 %v2479_v0 }
 0x1b5   : > { %v945_v59 = vpop.f32.mrf.mxu0  ;;  %2099 = vmatmul.mubr.msk.f32.gmra.mxu0 %vm586_vm1, %v2778_v5  ;;  %2131 = vmatmul.mubr.msk.f32.gmra.mxu1 %vm586_vm1, %v568_v46 }
 0x1b6   : > { %1429 = vmatprep.mubr.f32.mxu1 %v2479_v0 }
 0x1b7   : > { %v947_v60 = vpop.f32.mrf.mxu0 }
 0x1b9   : > { %v951_v62 = vpop.f32.mrf.mxu0  ;;  %2132 = vmatmul.mubr.msk.f32.gmra.mxu1 %vm586_vm1, %v569_v48  ;;  %v582_v48 = vpop.trf.xlu1 }
 0x1ba   : > { %1435 = vmatprep.mubr.f32.mxu1 %v2479_v0 }
 0x1bb   : > { %v953_v63 = vpop.f32.mrf.mxu0 }
 0x1bd   : > { %v957_v1 = vpop.f32.mrf.mxu0  ;;  %2133 = vmatmul.mubr.msk.f32.gmra.mxu1 %vm586_vm1, %v570_v51  ;;  %v583_v52 = vpop.trf.xlu1 }
 0x1be   : > { %v1520_v3 = vmax.f32 %v945_v59, %v957_v1  ;;  %1441 = vmatprep.mubr.f32.mxu1 %v2479_v0 }
 0x1bf   : > { %v959_v5 = vpop.f32.mrf.mxu0 }
 0x1c0   : > { %v1557_v6 = vmax.f32 %v947_v60, %v959_v5 }
 0x1c1   : > { %v963_v7 = vpop.f32.mrf.mxu0  ;;  %2134 = vmatmul.mubr.msk.f32.gmra.mxu1 %vm586_vm1, %v571_v53 }
 0x1c2   : > { %v1521_v8 = vmax.f32 %v951_v62, %v963_v7  ;;  %1447 = vmatprep.mubr.f32.mxu1 %v2479_v0 }
 0x1c3   : > { %v965_v9 = vpop.f32.mrf.mxu0 }
 0x1c4   : > { %v1558_v10 = vmax.f32 %v953_v63, %v965_v9 }
 0x1c5   : > { %v969_v12 = vpop.f32.mrf.mxu0  ;;  %2135 = vmatmul.mubr.msk.f32.gmra.mxu1 %vm586_vm1, %v572_v56 }
 0x1c6   : > { %v1522_v13 = vmax.f32 %v1520_v3, %v969_v12  ;;  %1453 = vmatprep.mubr.f32.mxu1 %v2479_v0 }
 0x1c7   : > { %v971_v14 = vpop.f32.mrf.mxu0 }
 0x1c8   : > { %v1559_v15 = vmax.f32 %v1557_v6, %v971_v14 }
 0x1c9   : > { %v975_v16 = vpop.f32.mrf.mxu0  ;;  %2136 = vmatmul.mubr.msk.f32.gmra.mxu1 %vm586_vm1, %v573_v58 }
 0x1ca   : > { %v1523_v17 = vmax.f32 %v1521_v8, %v975_v16  ;;  %1459 = vmatprep.mubr.f32.mxu1 %v2479_v0 }
 0x1cb   : > { %v977_v19 = vpop.f32.mrf.mxu0 }
 0x1cc   : > { %v1560_v20 = vmax.f32 %v1558_v10, %v977_v19 }
 0x1cd   : > { %v981_v21 = vpop.f32.mrf.mxu0  ;;  %2137 = vmatmul.mubr.msk.f32.gmra.mxu1 %vm586_vm1, %v574_v61 }
 0x1ce   : > { %v1524_v22 = vmax.f32 %v1522_v13, %v981_v21  ;;  %1465 = vmatprep.mubr.f32.mxu1 %v2479_v0 }
 0x1cf   : > { %v983_v23 = vpop.f32.mrf.mxu0 }
 0x1d0   : > { %v1561_v24 = vmax.f32 %v1559_v15, %v983_v23 }
 0x1d1   : > { %v987_v26 = vpop.f32.mrf.mxu0  ;;  %2138 = vmatmul.mubr.msk.f32.gmra.mxu1 %vm586_vm1, %v575_v4 }
 0x1d2   : > { %v1525_v27 = vmax.f32 %v1523_v17, %v987_v26  ;;  %1471 = vmatprep.mubr.f32.mxu1 %v2479_v0 }
 0x1d3   : > { %v989_v28 = vpop.f32.mrf.mxu0 }
 0x1d4   : > { %v1562_v29 = vmax.f32 %v1560_v20, %v989_v28 }
 0x1d5   : > { %v993_v30 = vpop.f32.mrf.mxu0  ;;  %2139 = vmatmul.mubr.msk.f32.gmra.mxu1 %vm586_vm1, %v576_v11 }
 0x1d6   : > { %v2977_v31 = vmax.f32 %v1524_v22, %v993_v30  ;;  %1477 = vmatprep.mubr.f32.mxu1 %v2479_v0 }
 0x1d7   : > { %v995_v33 = vpop.f32.mrf.mxu0 }
 0x1d8   : > { %v2980_v2 = vmax.f32 %v1561_v24, %v995_v33 }
 0x1d9   : > { %v999_v34 = vpop.f32.mrf.mxu0  ;;  %2140 = vmatmul.mubr.msk.f32.gmra.mxu1 %vm586_vm1, %v577_v18 }
 0x1da   : > { %v2983_v35 = vmax.f32 %v1525_v27, %v999_v34  ;;  %1483 = vmatprep.mubr.f32.mxu1 %v2479_v0 }
 0x1db   : > { %v1001_v36 = vpop.f32.mrf.mxu0 }
 0x1dc   : > { %v2986_v37 = vmax.f32 %v1562_v29, %v1001_v36 }
 0x1dd   : > { %v2988_v39 = vpop.f32.mrf.mxu0  ;;  %2141 = vmatmul.mubr.msk.f32.gmra.mxu1 %vm586_vm1, %v578_v25 }
 0x1de   : > { %v1528_v40 = vmax.f32 %v2977_v31, %v2988_v39  ;;  %1489 = vmatprep.mubr.f32.mxu1 %v2479_v0 }
 0x1df   : > { %v2994_v41 = vpop.f32.mrf.mxu0 }
 0x1e0   : > { %v1565_v42 = vmax.f32 %v2980_v2, %v2994_v41 }
 0x1e1   : > { %v2998_v43 = vpop.f32.mrf.mxu0  ;;  %2142 = vmatmul.mubr.msk.f32.gmra.mxu1 %vm586_vm1, %v579_v32 }
 0x1e2   : > { %1495 = vmatprep.mubr.f32.mxu1 %v2479_v0 }
 0x1e3   : > { %v3002_v45 = vpop.f32.mrf.mxu0 }
 0x1e5   : > { %v3004_v46 = vpop.f32.mrf.mxu0  ;;  %2143 = vmatmul.mubr.msk.f32.gmra.mxu1 %vm586_vm1, %v580_v38 }
 0x1e6   : > { %1501 = vmatprep.mubr.f32.mxu1 %v2479_v0 }
 0x1e7   : > { %v3008_v47 = vpop.f32.mrf.mxu0 }
 0x1e9   : > { %v3010_v49 = vpop.f32.mrf.mxu0  ;;  %2144 = vmatmul.mubr.msk.f32.gmra.mxu1 %vm586_vm1, %v581_v44 }
 0x1ea   : > { %1507 = vmatprep.mubr.f32.mxu1 %v2479_v0 }
 0x1eb   : > { %v3014_v50 = vpop.f32.mrf.mxu0 }
 0x1ed   : > { %v3016_v51 = vpop.f32.mrf.mxu0  ;;  %2145 = vmatmul.mubr.msk.f32.gmra.mxu1 %vm586_vm1, %v582_v48 }
 0x1ee   : > { %1513 = vmatprep.mubr.f32.mxu1 %v2479_v0 }
 0x1ef   : > { %v3020_v53 = vpop.f32.mrf.mxu0 }
 0x1f1   : > { %v3022_v54 = vpop.f32.mrf.mxu0  ;;  %2146 = vmatmul.mubr.msk.f32.gmra.mxu1 %vm586_vm1, %v583_v52 }
 0x1f2   : > { %1881 = vmatprep.mubr.f32.mxu1 %v2479_v0 }
 0x1f3   : > { %v3026_v55 = vpop.f32.mrf.mxu0 }
 0x1f5   : > { %v3028_v56 = vpop.f32.mrf.mxu0 }
 0x1f7   : > { %v3030_v57 = vpop.f32.mrf.mxu0 }
 0x1f9   : > { %v3032_v58 = vpop.f32.mrf.mxu0  ;;  %v1239_v59 = vpop.f32.mrf.mxu1 }
 0x1fb   : > { %v3034_v60 = vpop.f32.mrf.mxu0  ;;  %v1241_v61 = vpop.f32.mrf.mxu1 }
 0x1fd   : > { %v3036_v62 = vpop.f32.mrf.mxu0  ;;  %v1245_v63 = vpop.f32.mrf.mxu1 }
 0x1fe   : > { %v1630_v1 = vmax.f32 %v1245_v63, %v1239_v59 }
 0x1ff   : > { %v3038_v3 = vpop.f32.mrf.mxu0  ;;  %v1247_v4 = vpop.f32.mrf.mxu1 }
 0x200   : > { %v1667_v0 = vmax.f32 %v1247_v4, %v1241_v61 }
 0x201   : > { %v3040_v5 = vpop.f32.mrf.mxu0  ;;  %v1251_v6 = vpop.f32.mrf.mxu1 }
 0x202   : > { %v1632_v7 = vmax.f32 %v1630_v1, %v1251_v6 }
 0x203   : > { %v3042_v8 = vpop.f32.mrf.mxu0  ;;  %v1253_v9 = vpop.f32.mrf.mxu1 }
 0x204   : > { %v1669_v10 = vmax.f32 %v1667_v0, %v1253_v9 }
 0x205   : > { %v3044_v11 = vpop.f32.mrf.mxu0  ;;  %v1257_v12 = vpop.f32.mrf.mxu1 }
 0x206   : > { %v1634_v13 = vmax.f32 %v1632_v7, %v1257_v12  ;;  %v1529_v12 = vmax.f32 %v2983_v35, %v2998_v43  ;;  %v1567_v35 = vmax.f32 %v1565_v42, %v3008_v47  ;;  %v1807_v42 = vld [vmem:[%s3273_s2] sm:$0xff] }
 0x207   : > { %v3046_v14 = vpop.f32.mrf.mxu0  ;;  %v1259_v15 = vpop.f32.mrf.mxu1  ;;  %2149 = vmatmul.mubr.msk.f32.vlgmr.msra.gmra.mxu1 %vm586_vm1, %v1807_v42 }
 0x208   : > { %v1671_v16 = vmax.f32 %v1669_v10, %v1259_v15  ;;  %v1569_v31 = vmax.f32 %v1567_v35, %v3020_v53 }
 0x209   : > { %v3048_v17 = vpop.f32.mrf.mxu0  ;;  %v1263_v18 = vpop.f32.mrf.mxu1 }
 0x20a   : > { %v1636_v19 = vmax.f32 %v1634_v13, %v1263_v18  ;;  %v1566_v18 = vmax.f32 %v2986_v37, %v3002_v45  ;;  %v1571_v47 = vmax.f32 %v1569_v31, %v3030_v57 }
 0x20b   : > { %v3050_v20 = vpop.f32.mrf.mxu0  ;;  %v1265_v21 = vpop.f32.mrf.mxu1 }
 0x20c   : > { %v1673_v22 = vmax.f32 %v1671_v16, %v1265_v21  ;;  %v1531_v21 = vmax.f32 %v1529_v12, %v3010_v49 }
 0x20d   : > { %v3052_v23 = vpop.f32.mrf.mxu0  ;;  %v1269_v24 = vpop.f32.mrf.mxu1 }
 0x20e   : > { %v1638_v25 = vmax.f32 %v1636_v19, %v1269_v24  ;;  %v1530_v19 = vmax.f32 %v1528_v40, %v3004_v46  ;;  %v1533_v37 = vmax.f32 %v1531_v21, %v3022_v54 }
 0x20f   : > { %v3054_v26 = vpop.f32.mrf.mxu0  ;;  %v1271_v27 = vpop.f32.mrf.mxu1 }
 0x210   : > { %v1675_v28 = vmax.f32 %v1673_v22, %v1271_v27  ;;  %v1532_v27 = vmax.f32 %v1530_v19, %v3016_v51  ;;  %v1535_v2 = vmax.f32 %v1533_v37, %v3032_v58  ;;  %v1573_v58 = vmax.f32 %v1571_v47, %v3038_v3 }
 0x211   : > { %v3056_v29 = vpop.f32.mrf.mxu0  ;;  %v1275_v30 = vpop.f32.mrf.mxu1 }
 0x212   : > { %v1640_v32 = vmax.f32 %v1638_v25, %v1275_v30  ;;  %v1568_v25 = vmax.f32 %v1566_v18, %v3014_v50  ;;  %v1534_v49 = vmax.f32 %v1532_v27, %v3028_v56 }
 0x213   : > { %v3058_v33 = vpop.f32.mrf.mxu0  ;;  %v1277_v34 = vpop.f32.mrf.mxu1 }
 0x214   : > { %v1677_v36 = vmax.f32 %v1675_v28, %v1277_v34  ;;  %v1570_v46 = vmax.f32 %v1568_v25, %v3026_v55  ;;  %v1536_v54 = vmax.f32 %v1534_v49, %v3036_v62  ;;  %v1537_v55 = vmax.f32 %v1535_v2, %v3040_v5 }
 0x215   : > { %v3060_v38 = vpop.f32.mrf.mxu0  ;;  %v1281_v44 = vpop.f32.mrf.mxu1 }
 0x216   : > { %v1642_v48 = vmax.f32 %v1640_v32, %v1281_v44  ;;  %v1572_v53 = vmax.f32 %v1570_v46, %v3034_v60  ;;  %v1538_v34 = vmax.f32 %v1536_v54, %v3044_v11  ;;  %v1539_v57 = vmax.f32 %v1537_v55, %v3048_v17 }
 0x217   : > { %v3062_v52 = vpop.f32.mrf.mxu0  ;;  %v1283_v59 = vpop.f32.mrf.mxu1  ;;  %v1575_v44 = vmax.f32 %v1573_v58, %v3046_v14 }
 0x218   : > { %v1679_v61 = vmax.f32 %v1677_v36, %v1283_v59  ;;  %v1574_v32 = vmax.f32 %v1572_v53, %v3042_v8  ;;  %v1540_v5 = vmax.f32 %v1538_v34, %v3052_v23  ;;  %v1541_v59 = vmax.f32 %v1539_v57, %v3056_v29 }
 0x219   : > { %v1095_v63 = vpop.f32.mrf.mxu0  ;;  %v1287_v1 = vpop.f32.mrf.mxu1 }
 0x21a   : > { %v1631_v4 = vmax.f32 %v1287_v1, %v1642_v48  ;;  %v1576_v62 = vmax.f32 %v1574_v32, %v3050_v20  ;;  %v1542_v17 = vmax.f32 %v1540_v5, %v3060_v38 }
 0x21b   : > { %v1097_v0 = vpop.f32.mrf.mxu0  ;;  %v1289_v6 = vpop.f32.mrf.mxu1 }
 0x21c   : > { %v1668_v7 = vmax.f32 %v1289_v6, %v1679_v61  ;;  %v1577_v61 = vmax.f32 %v1575_v44, %v3054_v26  ;;  %v1578_v11 = vmax.f32 %v1576_v62, %v3058_v33 }
 0x21d   : > { %v3064_v9 = vpop.f32.mrf.mxu0  ;;  %v1293_v10 = vpop.f32.mrf.mxu1 }
 0x21e   : > { %v1633_v13 = vmax.f32 %v1631_v4, %v1293_v10  ;;  %v1543_v4 = vmax.f32 %v1541_v59, %v1095_v63  ;;  %v1579_v14 = vmax.f32 %v1577_v61, %v3062_v52  ;;  %v1580_v20 = vmax.f32 %v1578_v11, %v1097_v0 }
 0x21f   : > { %v3068_v15 = vpop.f32.mrf.mxu0  ;;  %v1295_v16 = vpop.f32.mrf.mxu1  ;;  %v1544_v23 = vmax.f32 %v1542_v17, %v3064_v9 }
 0x220   : > { %v1670_v22 = vmax.f32 %v1668_v7, %v1295_v16 }
 0x221   : > { %v1107_v43 = vpop.f32.mrf.mxu0  ;;  %v1299_v24 = vpop.f32.mrf.mxu1 }
 0x222   : > { %v1635_v45 = vmax.f32 %v1633_v13, %v1299_v24  ;;  %v1545_v12 = vmax.f32 %v1543_v4, %v1107_v43  ;;  %v1581_v13 = vmax.f32 %v1579_v14, %v3068_v15 }
 0x223   : > { %v1109_v39 = vpop.f32.mrf.mxu0  ;;  %v1301_v40 = vpop.f32.mrf.mxu1 }
 0x224   : > { %v1672_v41 = vmax.f32 %v1670_v22, %v1301_v40  ;;  %v1582_v18 = vmax.f32 %v1580_v20, %v1109_v39 }
 0x225   : > { %v1113_v50 = vpop.f32.mrf.mxu0  ;;  %v1305_v51 = vpop.f32.mrf.mxu1 }
 0x226   : > { %v1637_v56 = vmax.f32 %v1635_v45, %v1305_v51  ;;  %v1546_v19 = vmax.f32 %v1544_v23, %v1113_v50 }
 0x227   : > { %v1115_v28 = vpop.f32.mrf.mxu0  ;;  %v1307_v30 = vpop.f32.mrf.mxu1 }
 0x228   : > { %v1674_v36 = vmax.f32 %v1672_v41, %v1307_v30  ;;  %v1583_v38 = vmax.f32 %v1581_v13, %v1115_v28 }
 0x229   : > { %v1119_v48 = vpop.f32.mrf.mxu0  ;;  %v1311_v60 = vpop.f32.mrf.mxu1 }
 0x22a   : > { %v1639_v3 = vmax.f32 %v1637_v56, %v1311_v60  ;;  %v1547_v33 = vmax.f32 %v1545_v12, %v1119_v48 }
 0x22b   : > { %v1121_v1 = vpop.f32.mrf.mxu0  ;;  %v1313_v8 = vpop.f32.mrf.mxu1 }
 0x22c   : > { %v1676_v6 = vmax.f32 %v1674_v36, %v1313_v8  ;;  %v1584_v35 = vmax.f32 %v1582_v18, %v1121_v1 }
 0x22d   : > { %v1125_v7 = vpop.f32.mrf.mxu0  ;;  %v1317_v10 = vpop.f32.mrf.mxu1 }
 0x22e   : > { %v1641_v29 = vmax.f32 %v1639_v3, %v1317_v10  ;;  %v1548_v52 = vmax.f32 %v1546_v19, %v1125_v7 }
 0x22f   : > { %v1127_v26 = vpop.f32.mrf.mxu0  ;;  %v1319_v16 = vpop.f32.mrf.mxu1 }
 0x230   : > { %v1678_v21 = vmax.f32 %v1676_v6, %v1319_v16  ;;  %v1585_v43 = vmax.f32 %v1583_v38, %v1127_v26 }
 0x231   : > { %v1131_v63 = vpop.f32.mrf.mxu0  ;;  %v1323_v22 = vpop.f32.mrf.mxu1 }
 0x232   : > { %v1549_v24 = vmax.f32 %v1547_v33, %v1131_v63  ;;  %v3110_v25 = vmax.f32 %v1641_v29, %v1323_v22 }
 0x233   : > { %v1133_v0 = vpop.f32.mrf.mxu0  ;;  %v1325_v9 = vpop.f32.mrf.mxu1 }
 0x234   : > { %v1550_v27 = vmax.f32 %v1548_v52, %v1549_v24  ;;  %v1586_v37 = vmax.f32 %v1584_v35, %v1133_v0  ;;  %v3112_v15 = vmax.f32 %v1678_v21, %v1325_v9 }
 0x235   : > { %v3114_v45 = vpop.f32.mrf.mxu0  ;;  %v1329_v31 = vpop.f32.mrf.mxu1 }
 0x236   : > { %v1551_v39 = vrot.slane %v1550_v27, 4  ;;  %v1587_v40 = vmax.f32 %v1585_v43, %v1586_v37  ;;  %v2480_v37 = vmov 0  }
 0x237   : > { %v3116_v46 = vpop.f32.mrf.mxu0  ;;  %v1331_v49 = vpop.f32.mrf.mxu1  ;;  %2271 = vset.pattern.permute.xlu0 %v2480_v37 }
 0x238   : > { %v1552_v2 = vmax.f32 %v1550_v27, %v1551_v39  ;;  %v1588_v41 = vrot.slane %v1587_v40, 4 }
 0x239   : > { %v3118_v42 = vpop.f32.mrf.mxu0  ;;  %v1335_v47 = vpop.f32.mrf.mxu1 }
 0x23a   : > { %v1553_v50 = vrot.slane %v1552_v2, 2  ;;  %v1589_v51 = vmax.f32 %v1587_v40, %v1588_v41 }
 0x23b   : > { %v3120_v53 = vpop.f32.mrf.mxu0  ;;  %v1337_v54 = vpop.f32.mrf.mxu1 }
 0x23c   : > { %v1554_v55 = vmax.f32 %v1552_v2, %v1553_v50  ;;  %v1590_v56 = vrot.slane %v1589_v51, 2 }
 0x23d   : > { %v3122_v58 = vpop.f32.mrf.mxu0  ;;  %v1341_v28 = vpop.f32.mrf.mxu1 }
 0x23e   : > { %v1591_v30 = vmax.f32 %v1589_v51, %v1590_v56  ;;  %v1710_v32 = vmax.f32 %v1329_v31, %v1341_v28  ;;  %v1555_v34 = vrot.slane %v1554_v55, 1 }
 0x23f   : > { %v3124_v57 = vpop.f32.mrf.mxu0  ;;  %v1343_v36 = vpop.f32.mrf.mxu1 }
 0x240   : > { %v1747_v44 = vmax.f32 %v1331_v49, %v1343_v36  ;;  %v1592_v48 = vrot.slane %v1591_v30, 1  ;;  %v3126_v59 = vmax.f32 %v1554_v55, %v1555_v34  ;;  %v1652_v56 = vmax.f32 %v3116_v46, %v3124_v57 }
 0x241   : > { %v1155_v60 = vpop.f32.mrf.mxu0  ;;  %v1347_v62 = vpop.f32.mrf.mxu1 }
 0x242   : > { %v1711_v5 = vmax.f32 %v1335_v47, %v1347_v62  ;;  %v3128_v3 = vmax.f32 %v1591_v30, %v1592_v48  ;;  %v1615_v47 = vmax.f32 %v3114_v45, %v3122_v58  ;;  %v1616_v50 = vmax.f32 %v3118_v42, %v1155_v60 }
 0x243   : > { %v1157_v61 = vpop.f32.mrf.mxu0  ;;  %v1349_v1 = vpop.f32.mrf.mxu1 }
 0x244   : > { %v1748_v8 = vmax.f32 %v1337_v54, %v1349_v1  ;;  %v1597_v11 = vmax.f32 %v3126_v59, %v3128_v3  ;;  %v1594_v17 = vmin.f32 %v3126_v59, %v3128_v3  ;;  %v1653_v28 = vmax.f32 %v3120_v53, %v1157_v61 }
 0x245   : > { %v1161_v4 = vpop.f32.mrf.mxu0  ;;  %v1353_v6 = vpop.f32.mrf.mxu1 }
 0x246   : > { %v1712_v14 = vmax.f32 %v1710_v32, %v1353_v6  ;;  %1598 = vmax.xlane.f32.xlu1 %v1597_v11  ;;  %1595 = vmin.xlane.f32.xlu0 %v1594_v17  ;;  %v1617_v36 = vmax.f32 %v1615_v47, %v1161_v4 }
 0x247   : > { %v1163_v7 = vpop.f32.mrf.mxu0  ;;  %v1355_v10 = vpop.f32.mrf.mxu1 }
 0x248   : > { %v1749_v20 = vmax.f32 %v1747_v44, %v1355_v10  ;;  %v1654_v48 = vmax.f32 %v1652_v56, %v1163_v7 }
 0x249   : > { %v1167_v23 = vpop.f32.mrf.mxu0  ;;  %v1359_v12 = vpop.f32.mrf.mxu1 }
 0x24a   : > { %v1713_v29 = vmax.f32 %v1711_v5, %v1359_v12  ;;  %v1618_v44 = vmax.f32 %v1616_v50, %v1167_v23 }
 0x24b   : > { %v1169_v13 = vpop.f32.mrf.mxu0  ;;  %v1361_v26 = vpop.f32.mrf.mxu1 }
 0x24c   : > { %v1750_v16 = vmax.f32 %v1748_v8, %v1361_v26  ;;  %v1655_v60 = vmax.f32 %v1653_v28, %v1169_v13 }
 0x24d   : > { %v1173_v18 = vpop.f32.mrf.mxu0  ;;  %v1365_v19 = vpop.f32.mrf.mxu1 }
 0x24e   : > { %v1714_v33 = vmax.f32 %v1712_v14, %v1365_v19  ;;  %v1619_v62 = vmax.f32 %v1617_v36, %v1173_v18 }
 0x24f   : > { %v1175_v21 = vpop.f32.mrf.mxu0  ;;  %v1367_v38 = vpop.f32.mrf.mxu1 }
 0x250   : > { %v1751_v63 = vmax.f32 %v1749_v20, %v1367_v38  ;;  %v1656_v8 = vmax.f32 %v1654_v48, %v1175_v21 }
 0x251   : > { %v1179_v22 = vpop.f32.mrf.mxu0  ;;  %v1371_v35 = vpop.f32.mrf.mxu1 }
 0x252   : > { %v1715_v52 = vmax.f32 %v1713_v29, %v1371_v35  ;;  %v1620_v5 = vmax.f32 %v1618_v44, %v1179_v22 }
 0x253   : > { %v1181_v24 = vpop.f32.mrf.mxu0  ;;  %v1373_v0 = vpop.f32.mrf.mxu1 }
 0x254   : > { %v1752_v9 = vmax.f32 %v1750_v16, %v1373_v0  ;;  %v1657_v11 = vmax.f32 %v1655_v60, %v1181_v24 }
 0x255   : > { %v1185_v43 = vpop.f32.mrf.mxu0  ;;  %v1377_v27 = vpop.f32.mrf.mxu1 }
 0x256   : > { %v3134_v31 = vmax.f32 %v1714_v33, %v1377_v27  ;;  %v1621_v6 = vmax.f32 %v1619_v62, %v1185_v43 }
 0x257   : > { %v1187_v39 = vpop.f32.mrf.mxu0  ;;  %v1379_v40 = vpop.f32.mrf.mxu1 }
 0x258   : > { %v3136_v49 = vmax.f32 %v1751_v63, %v1379_v40  ;;  %v1658_v20 = vmax.f32 %v1656_v8, %v1187_v39 }
 0x259   : > { %v1191_v2 = vpop.f32.mrf.mxu0  ;;  %v1383_v41 = vpop.f32.mrf.mxu1 }
 0x25a   : > { %v3141_v51 = vmax.f32 %v1715_v52, %v1383_v41  ;;  %v1622_v14 = vmax.f32 %v1620_v5, %v1191_v2 }
 0x25b   : > { %v1193_v54 = vpop.f32.mrf.mxu0  ;;  %v1385_v55 = vpop.f32.mrf.mxu1 }
 0x25c   : > { %v3146_v30 = vmax.f32 %v1752_v9, %v1385_v55  ;;  %v1659_v23 = vmax.f32 %v1657_v11, %v1193_v54 }
 0x25d   : > { %v1197_v32 = vpop.f32.mrf.mxu0  ;;  %v3148_v34 = vpop.f32.mrf.mxu1 }
 0x25e   : > { %v1718_v45 = vmax.f32 %v3134_v31, %v3148_v34  ;;  %v1623_v13 = vmax.f32 %v1621_v6, %v1197_v32 }
 0x25f   : > { %v1199_v42 = vpop.f32.mrf.mxu0  ;;  %v3152_v58 = vpop.f32.mrf.mxu1 }
 0x260   : > { %v1755_v46 = vmax.f32 %v3136_v49, %v3152_v58  ;;  %v1660_v19 = vmax.f32 %v1658_v20, %v1199_v42 }
 0x261   : > { %v1203_v57 = vpop.f32.mrf.mxu0  ;;  %v3156_v53 = vpop.f32.mrf.mxu1 }
 0x262   : > { %v1624_v26 = vmax.f32 %v1622_v14, %v1203_v57 }
 0x263   : > { %v1205_v61 = vpop.f32.mrf.mxu0  ;;  %v3158_v1 = vpop.f32.mrf.mxu1 }
 0x264   : > { %v1661_v33 = vmax.f32 %v1659_v23, %v1205_v61 }
 0x265   : > { %v1209_v17 = vpop.f32.mrf.mxu0  ;;  %v3160_v4 = vpop.f32.mrf.mxu1 }
 0x266   : > { %v1625_v63 = vmax.f32 %v1623_v13, %v1209_v17 }
 0x267   : > { %v1211_v7 = vpop.f32.mrf.mxu0  ;;  %v3162_v10 = vpop.f32.mrf.mxu1 }
 0x268   : > { %v1662_v24 = vmax.f32 %v1660_v19, %v1211_v7 }
 0x269   : > { %v1215_v12 = vpop.f32.mrf.mxu0  ;;  %v3164_v29 = vpop.f32.mrf.mxu1 }
 0x26a   : > { %v1626_v22 = vmax.f32 %v1624_v26, %v1215_v12 }
 0x26b   : > { %v1217_v16 = vpop.f32.mrf.mxu0  ;;  %v3166_v18 = vpop.f32.mrf.mxu1 }
 0x26c   : > { %v1663_v0 = vmax.f32 %v1661_v33, %v1217_v16 }
 0x26d   : > { %v1221_v21 = vpop.f32.mrf.mxu0  ;;  %v3168_v38 = vpop.f32.mrf.mxu1 }
 0x26e   : > { %v1627_v27 = vmax.f32 %v1625_v63, %v1221_v21 }
 0x26f   : > { %v1223_v35 = vpop.f32.mrf.mxu0  ;;  %v3170_v52 = vpop.f32.mrf.mxu1 }
 0x270   : > { %v1664_v2 = vmax.f32 %v1662_v24, %v1223_v35 }
 0x271   : > { %v1227_v9 = vpop.f32.mrf.mxu0  ;;  %v3172_v43 = vpop.f32.mrf.mxu1 }
 0x272   : > { %v1628_v37 = vmax.f32 %v1626_v22, %v1227_v9 }
 0x273   : > { %v1229_v39 = vpop.f32.mrf.mxu0  ;;  %v3174_v40 = vpop.f32.mrf.mxu1 }
 0x274   : > { %v1665_v41 = vmax.f32 %v1663_v0, %v1229_v39  ;;  %v1644_v54 = vmax.f32 %v1628_v37, %v3110_v25 }
 0x275   : > { %v1233_v47 = vpop.f32.mrf.mxu0  ;;  %v1425_v50 = vpop.f32.mrf.mxu1 }
 0x276   : > { %v1629_v55 = vmax.f32 %v1627_v27, %v1233_v47  ;;  %v1681_v32 = vmax.f32 %v1665_v41, %v3112_v15  ;;  %v1719_v41 = vmax.f32 %v3141_v51, %v3156_v53 }
 0x277   : > { %v1235_v56 = vpop.f32.mrf.mxu0  ;;  %v1427_v28 = vpop.f32.mrf.mxu1 }
 0x278   : > { %v1645_v36 = vmax.f32 %v1629_v55, %v1644_v54  ;;  %v1666_v44 = vmax.f32 %v1664_v2, %v1235_v56  ;;  %v1756_v54 = vmax.f32 %v3146_v30, %v3158_v1  ;;  %v1720_v55 = vmax.f32 %v1718_v45, %v3160_v4 }
 0x279   : > { %v1431_v42 = vpop.f32.mrf.mxu1  ;;  %v1721_v56 = vmax.f32 %v1719_v41, %v3164_v29 }
 0x27a   : > { %v1682_v48 = vmax.f32 %v1666_v44, %v1681_v32  ;;  %v1646_v60 = vrot.slane %v1645_v36, 4  ;;  %v1758_v44 = vmax.f32 %v1756_v54, %v3166_v18  ;;  %v1722_v51 = vmax.f32 %v1720_v55, %v3168_v38 }
 0x27b   : > { %v1433_v57 = vpop.f32.mrf.mxu1  ;;  %v1723_v53 = vmax.f32 %v1721_v56, %v3172_v43 }
 0x27c   : > { %v1647_v62 = vmax.f32 %v1645_v36, %v1646_v60  ;;  %v1683_v5 = vrot.slane %v1682_v48, 4  ;;  %v1757_v36 = vmax.f32 %v1755_v46, %v3162_v10  ;;  %v1760_v31 = vmax.f32 %v1758_v44, %v3174_v40 }
 0x27d   : > { %v1437_v61 = vpop.f32.mrf.mxu1  ;;  %v1724_v34 = vmax.f32 %v1722_v51, %v1425_v50  ;;  %v1725_v45 = vmax.f32 %v1723_v53, %v1431_v42  ;;  %v1898_v53 = vld [vmem:[%s3274_s3] sm:$0xf] }
 0x27e   : > { %v1648_v8 = vrot.slane %v1647_v62, 2  ;;  %v1684_v11 = vmax.f32 %v1682_v48, %v1683_v5  ;;  %v1759_v1 = vmax.f32 %v1757_v36, %v3170_v52  ;;  %v1762_v48 = vmax.f32 %v1760_v31, %v1433_v57 }
 0x27f   : > { %v1439_v17 = vpop.f32.mrf.mxu1  ;;  %v1726_v60 = vmax.f32 %v1724_v34, %v1437_v61 }
 0x280   : > { %v1649_v6 = vmax.f32 %v1647_v62, %v1648_v8  ;;  %v1685_v14 = vrot.slane %v1684_v11, 2  ;;  %v1761_v29 = vmax.f32 %v1759_v1, %v1427_v28 }
 0x281   : > { %v1443_v25 = vpop.f32.mrf.mxu1 }
 0x282   : > { %v1650_v7 = vrot.slane %v1649_v6, 1  ;;  %v1686_v20 = vmax.f32 %v1684_v11, %v1685_v14  ;;  %v1727_v62 = vmax.f32 %v1725_v45, %v1443_v25  ;;  %v1763_v58 = vmax.f32 %v1761_v29, %v1439_v17 }
 0x283   : > { %v1445_v23 = vpop.f32.mrf.mxu1 }
 0x284   : > { %v1687_v12 = vrot.slane %v1686_v20, 1  ;;  %v3178_v13 = vmax.f32 %v1649_v6, %v1650_v7  ;;  %v1764_v46 = vmax.f32 %v1762_v48, %v1445_v23 }
 0x285   : > { %v1449_v15 = vpop.f32.mrf.mxu1 }
 0x286   : > { %v3180_v26 = vmax.f32 %v1686_v20, %v1687_v12  ;;  %v1728_v10 = vmax.f32 %v1726_v60, %v1449_v15 }
 0x287   : > { %v1451_v16 = vpop.f32.mrf.mxu1 }
 0x288   : > { %v1689_v19 = vmin.f32 %v3178_v13, %v3180_v26  ;;  %v1692_v63 = vmax.f32 %v3178_v13, %v3180_v26  ;;  %v1765_v5 = vmax.f32 %v1763_v58, %v1451_v16 }
 0x289   : > { %v1455_v33 = vpop.f32.mrf.mxu1 }
 0x28a   : > { %1690 = vmin.xlane.f32.xlu1 %v1689_v19  ;;  %v1729_v18 = vmax.f32 %v1727_v62, %v1455_v33 }
 0x28b   : > { %v1457_v21 = vpop.f32.mrf.mxu1 }
 0x28c   : > { %v1766_v43 = vmax.f32 %v1764_v46, %v1457_v21 }
 0x28d   : > { %v1461_v22 = vpop.f32.mrf.mxu1 }
 0x28e   : > { %1693 = vmax.xlane.f32.xlu1 %v1692_v63  ;;  %v1730_v8 = vmax.f32 %v1728_v10, %v1461_v22 }
 0x28f   : > { %v1463_v35 = vpop.f32.mrf.mxu1 }
 0x290   : > { %v1767_v6 = vmax.f32 %v1765_v5, %v1463_v35 }
 0x291   : > { %v1467_v24 = vpop.f32.mrf.mxu1 }
 0x292   : > { %v1731_v11 = vmax.f32 %v1729_v18, %v1467_v24 }
 0x293   : > { %v1469_v0 = vpop.f32.mrf.mxu1 }
 0x294   : > { %v1768_v40 = vmax.f32 %v1766_v43, %v1469_v0 }
 0x295   : > { %v1473_v9 = vpop.f32.mrf.mxu1 }
 0x296   : > { %v1732_v50 = vmax.f32 %v1730_v8, %v1473_v9 }
 0x297   : > { %v1475_v27 = vpop.f32.mrf.mxu1 }
 0x298   : > { %v1769_v28 = vmax.f32 %v1767_v6, %v1475_v27 }
 0x299   : > { %v1479_v37 = vpop.f32.mrf.mxu1 }
 0x29a   : > { %v1733_v42 = vmax.f32 %v1731_v11, %v1479_v37 }
 0x29b   : > { %v1481_v39 = vpop.f32.mrf.mxu1 }
 0x29c   : > { %v1770_v57 = vmax.f32 %v1768_v40, %v1481_v39 }
 0x29d   : > { %v1485_v2 = vpop.f32.mrf.mxu1 }
 0x29e   : > { %v1734_v61 = vmax.f32 %v1732_v50, %v1485_v2  ;;  %v1610_v50 = vstv %s1609_s4  ;;  %s2481_s4 = smov [#allocation7]  }
 0x29f   : > { %v1487_v47 = vpop.f32.mrf.mxu1 }
 0x2a0   : > { %v1771_v17 = vmax.f32 %v1769_v28, %v1487_v47 }
 0x2a1   : > { %v1491_v32 = vpop.f32.mrf.mxu1 }
 0x2a2   : > { %v1735_v25 = vmax.f32 %v1733_v42, %v1491_v32 }
 0x2a3   : > { %v1493_v30 = vpop.f32.mrf.mxu1 }
 0x2a4   : > { %v1772_v20 = vmax.f32 %v1770_v57, %v1493_v30 }
 0x2a5   : > { %v1497_v4 = vpop.f32.mrf.mxu1 }
 0x2a6   : > { %v1736_v23 = vmax.f32 %v1734_v61, %v1497_v4 }
 0x2a7   : > { %v1499_v49 = vpop.f32.mrf.mxu1 }
 0x2a8   : > { %v1773_v16 = vmax.f32 %v1771_v17, %v1499_v49 }
 0x2a9   : > { %v1503_v38 = vpop.f32.mrf.mxu1 }
 0x2aa   : > { %v1737_v12 = vmax.f32 %v1735_v25, %v1503_v38 }
 0x2ab   : > { %v1505_v52 = vpop.f32.mrf.mxu1 }
 0x2ac   : > { %v1774_v19 = vmax.f32 %v1772_v20, %v1505_v52  ;;  %v1705_v52 = vstv %s1704_s18  ;;  %s1912_s18 = scalar_lea.sflag [#allocation4], %s2681_s24 }
 0x2ad   : > { %v1509_v14 = vpop.f32.mrf.mxu1 }
 0x2ae   : > { %v1738_v33 = vmax.f32 %v1736_v23, %v1509_v14 }
 0x2af   : > { %v1511_v7 = vpop.f32.mrf.mxu1 }
 0x2b0   : > { %v1775_v22 = vmax.f32 %v1773_v16, %v1511_v7 }
 0x2b1   : > { %v1515_v15 = vpop.f32.mrf.mxu1 }
 0x2b2   : > { %v1739_v21 = vmax.f32 %v1737_v12, %v1515_v15 }
 0x2b3   : > { %v1517_v63 = vpop.f32.mrf.mxu1 }
 0x2b4   : > { %v1740_v35 = vmax.f32 %v1738_v33, %v1739_v21  ;;  %v1776_v24 = vmax.f32 %v1774_v19, %v1517_v63 }
 0x2b6   : > { %v1741_v0 = vrot.slane %v1740_v35, 4  ;;  %v1777_v9 = vmax.f32 %v1775_v22, %v1776_v24 }
 0x2b8   : > { %v1742_v27 = vmax.f32 %v1740_v35, %v1741_v0  ;;  %v1778_v37 = vrot.slane %v1777_v9, 4 }
 0x2ba   : > { %v1743_v39 = vrot.slane %v1742_v27, 2  ;;  %v1779_v2 = vmax.f32 %v1777_v9, %v1778_v37 }
 0x2bc   : > { %v1744_v41 = vmax.f32 %v1742_v27, %v1743_v39  ;;  %v1780_v47 = vrot.slane %v1779_v2, 2 }
 0x2be   : > { %v1745_v54 = vrot.slane %v1744_v41, 1  ;;  %v1781_v55 = vmax.f32 %v1779_v2, %v1780_v47 }
 0x2c0   : > { %v1782_v56 = vrot.slane %v1781_v55, 1  ;;  %v1746_v32 = vmax.f32 %v1744_v41, %v1745_v54 }
 0x2c2   : > { %v1783_v36 = vmax.f32 %v1781_v55, %v1782_v56 }
 0x2c4   : > { %v1787_v44 = vmax.f32 %v1746_v32, %v1783_v36  ;;  %v1784_v51 = vmin.f32 %v1746_v32, %v1783_v36 }
 0x2c6   : > { %1788 = vmax.xlane.f32.xlu1 %v1787_v44  ;;  %1785 = vmin.xlane.f32.xlu0 %v1784_v51 }
 0x2c7   : > { %v1883_v12 = vpop.f32.mrf.mxu1 }
 0x2c9   : > { %v1885_v21 = vpop.f32.mrf.mxu1 }
 0x2cf   : > { %v1599_v30 = vpop.xlane.xlu1 %1598  ;;  %v1596_v34 = vpop.xlane.xlu0 %1595 }
 0x2d0   : > { %v1602_v4 = vsub.f32 %v1599_v30, %v1596_v34  ;;  %v1600_v5 = vsub.f32 %v3126_v59, %v1596_v34  ;;  %v1601_v43 = vsub.f32 %v3128_v3, %v1596_v34 }
 0x2d2   : > { %v1603_v48 = vadd.f32 1e-07, %v1602_v4 }
 0x2dc   : > { %1901 = vperm.xlu0 %2271, %v1898_v53  }
 0x313   : > { %v1691_v1 = vpop.xlane.xlu1 %1690 }
 0x314   : > { %v1695_v10 = vsub.f32 %v3178_v13, %v1691_v1  ;;  %v1696_v18 = vsub.f32 %v3180_v26, %v1691_v1  ;;  %v1800_v26 = vstv %s1799_s8  ;;  %s2355_s8 = sshll.u32 %s2481_s4, 4  ;;  %s2356_s8 = int_to_ptr.vmem [resolvable:$false] %s2355_s8 }
 0x315   : > { %s2357_s22 = scalar_lea.vmem %s2356_s8, 256  ;;  %p2358_p2 = scmp.lt.s32.totalorder %s1929_s9, %s2356_s8 }
 0x316   : > { %p2359_p4 = scmp.lt.s32.totalorder %s2357_s22, %s2351_s0 }
 0x317   : > { %v1694_v31 = vpop.xlane.xlu1 %1693 }
 0x318   : > { %v1697_v45 = vsub.f32 %v1694_v31, %v1691_v1  ;;  %p2360_p5 = por %p2359_p4, %p2358_p2 }
 0x31a   : > { %v1698_v29 = vadd.f32 1e-07, %v1697_v45  ;;  %p2361_p7 = pnand %p2360_p5, %p2354_p8 }
 0x31c   : > { %2289 = vrcp.f32 %v1698_v29 }
 0x31d   : > { %2291 = vrcp.f32 %v1603_v48 }
 0x329   : > { %v2290_v46 = vpop.eup %2289 }
 0x32a   : > { %v2292_v38 = vpop.eup %2291  ;;  %v1700_v8 = vmul.f32 %v2290_v46, %v1695_v10  ;;  %v1701_v11 = vmul.f32 %v2290_v46, %v1696_v18 }
 0x32b   : > { %v1605_v6 = vmul.f32 %v2292_v38, %v1600_v5  ;;  %v1606_v40 = vmul.f32 %v2292_v38, %v1601_v43 }
 0x32c   : > { %v1706_v28 = vmul.f32 %v1705_v52, %v1700_v8  ;;  %v1707_v57 = vmul.f32 %v1705_v52, %v1701_v11 }
 0x32d   : > { %v1611_v61 = vmul.f32 %v1610_v50, %v1605_v6  ;;  %v1612_v59 = vmul.f32 %v1610_v50, %v1606_v40 }
 0x32f   : > { %v1708_v3 = vadd.f32 %v1706_v28, %v1611_v61  ;;  %v1709_v20 = vadd.f32 %v1707_v57, %v1612_v59 }
 0x34f   : > { %v1786_v60 = vpop.xlane.xlu0 %1785  ;;  %v1789_v62 = vpop.xlane.xlu1 %1788 }
 0x350   : > { %v1792_v49 = vsub.f32 %v1789_v62, %v1786_v60  ;;  %v1790_v42 = vsub.f32 %v1746_v32, %v1786_v60  ;;  %v1791_v14 = vsub.f32 %v1783_v36, %v1786_v60 }
 0x352   : > { %v1793_v58 = vadd.f32 1e-07, %v1792_v49 }
 0x354   : > { %2293 = vrcp.f32 %v1793_v58 }
 0x357   : > { %v1902_v0 = vpop.permute.xlu0 %1901 }
 0x361   : > { %v2294_v13 = vpop.eup %2293 }
 0x362   : > { %v1795_v25 = vmul.f32 %v2294_v13, %v1790_v42  ;;  %v1796_v7 = vmul.f32 %v2294_v13, %v1791_v14 }
 0x364   : > { %v1801_v17 = vmul.f32 %v1800_v26, %v1795_v25  ;;  %v1802_v23 = vmul.f32 %v1800_v26, %v1796_v7 }
 0x366   : > { %v1803_v15 = vadd.f32 %v1801_v17, %v1708_v3  ;;  %v1804_v16 = vadd.f32 %v1802_v23, %v1709_v20 }
 0x368   : > { %v1805_v19 = vmul.f32 0.5, %v1803_v15  ;;  %v1806_v33 = vmul.f32 0.5, %v1804_v16 }
 0x36a   : > { %v1888_v63 = vmul.f32 %v1883_v12, %v1805_v19  ;;  %v1889_v22 = vmul.f32 %v1885_v21, %v1806_v33 }
 0x36c   : > { %v1892_v35 = vrot.slane %v1888_v63, 4  ;;  %v1893_v24 = vrot.slane %v1889_v22, 4 }
 0x36e   : > { %v1896_v9 = vadd.f32 %v1892_v35, %v1883_v12  ;;  %v1897_v27 = vadd.f32 %v1893_v24, %v1885_v21 }
 0x370   : > { %v1904_v37 = vadd.f32 %v1902_v0, %v1896_v9  ;;  %v1905_v39 = vadd.f32 %v1902_v0, %v1897_v27 }
 0x372   : > { %v1908_v2 = vcombine.low %v1904_v37, %v1905_v39 }
 0x374   : > { %1910 = vst [vmem:[%s269_s30] sm:$0xff] %v1908_v2 }
 0x375   : > { %2364 = shalt.err (!%p2361_p7)
}
 0x376   : > { %s2365_s15 = scalar_lea.hbm %s1926_s5, 128  ;;  %s2369_s6 = scalar_lea.hbm %s3308_s14, 768 }
 0x377   : > { %p2366_p3 = scmp.ne.s32.totalorder %s1926_s5, %s2365_s15  ;;  %p2370_p10 = scmp.lt.s32.totalorder %s1926_s5, %s3308_s14 }
 0x378   : > { %p2371_p0 = scmp.lt.s32.totalorder %s2369_s6, %s2365_s15 }
 0x379   : > { %p2367_p11 = pnand %p2366_p3, %p2635_p1 }
 0x37a   : > { %p2372_p12 = por %p2371_p0, %p2370_p10 }
 0x37b   : > { %p2368_p6 = pneg %p2367_p11 }
 0x37d   : > { %p2373_p13 = pnand %p2372_p12, %p2368_p6 }
 0x37f   : > { %2376 = shalt.err (!%p2373_p13)
}
 0x380   : > { %2166 = dma.vmem_to_hbm [thread:$0]  (%p2635_p1), %s1929_s9, 128, %s1926_s5, %s1912_s18  }
 0x381 PF: > { %s3309_s30 = sld [smem:[#allocation11_spill]]  ;;  %p2180_p8 = scmp.ge.s32.totalorder %s2475_s25, 2 }
 0x383   : > { %p2176_p2 = pnand %p2180_p8, %p2639_p9 }
 0x385   : > { %p2177_p4 = pneg %p2176_p2 }
 0x387   : > { %s1940_s7 = sand.u32 1, %s3309_s30  }
 0x388   : > { %s1941_s29 = scalar_lea.sflag [#allocation4], %s1940_s7 }
 0x389   : > { %2430 = dma.done.wait (%p2177_p4), %s1941_s29, 128  }
 0x38a   : > { %2432 = vsyncadd (%p2177_p4), %s1941_s29, 4294967168  ;;  %s23_s25 = sadd.s32 1, %s2475_s25   ;;  %s3310_s22 = sld [smem:[#allocation13_spill]] }
 0x38b   : > { %p20_p5 = scmp.ge.s32.totalorder %s23_s25, 8   ;;  %s3311_s26 = sld [smem:[#allocation14_spill]] }
 0x38c   : > { %s3312_s24 = sld [smem:[#allocation15_spill]]  ;;  %s3313_s15 = smov %s2439_s16 }
 0x38d   : > { %s3314_s16 = smov %s2443_s17  ;;  %s3315_s17 = smov %s2652_s10 }
 0x38e   : > { %s3316_s18 = smov %s2451_s19  ;;  %s3317_s19 = smov %s2455_s20 }
 0x38f   : > { %s3318_s20 = smov %s2649_s27  ;;  %s3319_s21 = smov %s2467_s23 }
 0x390   :  { %22 = sbr.rel (!%p20_p5) target bundleno = 14 (0xe), region = 94 }
 0x391   : > { %s3320_s23 = smov %s3311_s26 }
 0x395   :  { %1946 = vsyncpa [#allocation3], 1 }
 0x396   :  { %1948 = vsyncpa [#allocation3 + $0x1], 1 }
 0x397   :  { %1949 = vsyncpa [#allocation6], 1 }
 0x398   :  { %1951 = vsyncpa [#allocation6 + $0x1], 1 }
 0x399   :  { %1952 = vsyncpa [#allocation4], 1 }
 0x39a   :  { %1954 = vsyncpa [#allocation4 + $0x1], 1 }

</bundles_post_ra>
